<compile_context>
chip_gen: v7x
topology: tpu7x:2x2x1
jax: 0.10.0
libtpu: 0.0.40
codegen_flags: <defaults>
</compile_context>

<pallas_src>
import functools

import jax
import jax.numpy as jnp
from jax.experimental import pallas as pl
from jax.experimental.pallas import tpu as pltpu


def _pick_tile_h(h_out, w_out, n_batch, max_rows=512, min_rows=128):
    """Pick an output-row tile: a divisor of h_out whose (tile_h*w_out, C_out) slab is
    small (bounds VMEM / vreg pressure), keeps tile_rows % 8 == 0 for the (8,128)
    sublane constraint, and prefers >= 4 total grid steps (feeds both v7x cores)."""
    divs = [d for d in range(1, h_out + 1) if h_out % d == 0]
    valid = [d for d in divs if d * w_out <= max_rows and (d * w_out) % 8 == 0]
    if not valid:
        return h_out                                  # single full-image tile
    for d in sorted(valid, reverse=True):
        if n_batch * (h_out // d) >= 4 and d * w_out >= min_rows:
            return d
    return max(valid)


def _conv_row_tile(x_ref, w_ref, t, *, tile_h, w_out, stride, kh, kw):
    """Direct conv for one tile of output rows as ONE MXU matmul.

    x_ref: (1, H_pad, W_pad, C_in) bf16 block (whole padded image of one batch elem)
    w_ref: (KH*KW*C_in, C_out)     bf16 block (tap-major, channel-minor rows)
    returns: (tile_h * w_out, C_out) f32
    """
    c_in = x_ref.shape[3]
    in_rows = (tile_h - 1) * stride + kh              # input rows feeding this tile
    r0 = t * tile_h * stride
    if (tile_h * stride) % 8 == 0:
        r0 = pl.multiple_of(r0, 8)                    # 8-aligned major-dim offset hint
    xw = x_ref[0, pl.ds(r0, in_rows), :, :]           # (in_rows, W_pad, C_in)

    # Concatenate the KH*KW shifted windows along the lane (channel) axis so the whole
    # conv is a single K = KH*KW*C_in contraction on the MXU (instead of KH*KW K=C_in
    # matmuls + accumulate adds).
    taps = []
    for i in range(kh):                               # static unroll
        for j in range(kw):
            taps.append(jax.lax.slice(
                xw,
                (i, j, 0),
                (i + (tile_h - 1) * stride + 1,
                 j + (w_out - 1) * stride + 1,
                 c_in),
                (stride, stride, 1)))                 # (tile_h, w_out, C_in)
    lhs = jnp.concatenate(taps, axis=-1)              # (tile_h, w_out, KH*KW*C_in)
    lhs = lhs.reshape(tile_h * w_out, kh * kw * c_in)
    return jnp.dot(lhs, w_ref[...], preferred_element_type=jnp.float32)


# ----------------------------------------------------------------------------
# Pass 1: per-image channel sum / sum-of-squares of the conv output (no y writeback)
# ----------------------------------------------------------------------------
def _conv_stats_kernel(x_ref, w_ref, sum_ref, ssq_ref, *, tile_h, w_out, stride, kh, kw):
    t = pl.program_id(1)

    @pl.when(t == 0)
    def _():
        sum_ref[...] = jnp.zeros_like(sum_ref)
        ssq_ref[...] = jnp.zeros_like(ssq_ref)

    acc = _conv_row_tile(x_ref, w_ref, t, tile_h=tile_h, w_out=w_out,
                         stride=stride, kh=kh, kw=kw)          # (rows, C_out) f32
    sum_ref[0] = sum_ref[0] + jnp.sum(acc, axis=0, keepdims=True)
    ssq_ref[0] = ssq_ref[0] + jnp.sum(acc * acc, axis=0, keepdims=True)


# ----------------------------------------------------------------------------
# Pass 2: recompute conv (cheap) fused with BatchNorm scale/shift + ReLU
# ----------------------------------------------------------------------------
def _conv_bn_relu_kernel(x_ref, w_ref, scale_ref, shift_ref, o_ref, *,
                         tile_h, w_out, stride, kh, kw):
    t = pl.program_id(1)
    acc = _conv_row_tile(x_ref, w_ref, t, tile_h=tile_h, w_out=w_out,
                         stride=stride, kh=kh, kw=kw)          # (rows, C_out) f32
    o_ref[0] = jnp.maximum(acc * scale_ref[...] + shift_ref[...], 0.0)


@functools.partial(jax.jit, static_argnames=("stride", "padding"))
def conv_block_forward(x_nchw, weight, bias, gamma, beta, *, stride, padding, eps=1e-5):
    """ConvBlock forward: Conv2d -> BatchNorm2d (batch stats) -> ReLU.

    x_nchw: (N, C_in, H, W)   weight: (C_out, C_in, KH, KW)   bias: (C_out,)
    gamma, beta: (C_out,)     returns: (N, C_out, H_out, W_out) float32
    """
    n, c_in, h, w = x_nchw.shape
    c_out, _, kh, kw = weight.shape
    h_out = (h + 2 * padding - kh) // stride + 1
    w_out = (w + 2 * padding - kw) // stride + 1
    hw = h_out * w_out
    m = n * hw
    h_pad = h + 2 * padding
    w_pad = w + 2 * padding

    tile_h = _pick_tile_h(h_out, w_out, n)
    n_tiles = h_out // tile_h
    tile_rows = tile_h * w_out

    # glue: NCHW -> padded NHWC bf16 (native MXU dtype; intentional precision trade).
    x_nhwc = jnp.transpose(x_nchw, (0, 2, 3, 1))
    x_padded = jnp.pad(
        x_nhwc, ((0, 0), (padding, padding), (padding, padding), (0, 0))
    ).astype(jnp.bfloat16)

    # weight (C_out, C_in, KH, KW) -> (KH*KW*C_in, C_out): tap-major, channel-minor rows
    # matching the in-kernel lane concatenation order.
    w_mat = jnp.transpose(weight, (2, 3, 1, 0)).reshape(kh * kw * c_in, c_out)
    w_mat = w_mat.astype(jnp.bfloat16)

    # Conv bias cancels exactly under train-mode BatchNorm -> not applied.
    del bias

    x_spec = pl.BlockSpec((1, h_pad, w_pad, c_in), lambda b, t: (b, 0, 0, 0))
    w_spec = pl.BlockSpec((kh * kw * c_in, c_out), lambda b, t: (0, 0))

    # ---- Pallas call 1: conv + per-image channel stats (tiny outputs only) ----------
    stats_kernel = functools.partial(_conv_stats_kernel, tile_h=tile_h, w_out=w_out,
                                     stride=stride, kh=kh, kw=kw)
    psum, pssq = pl.pallas_call(
        stats_kernel,
        out_shape=(jax.ShapeDtypeStruct((n, 1, c_out), jnp.float32),
                   jax.ShapeDtypeStruct((n, 1, c_out), jnp.float32)),
        grid_spec=pltpu.PrefetchScalarGridSpec(
            num_scalar_prefetch=0,
            grid=(n, n_tiles),
            in_specs=[x_spec, w_spec],
            out_specs=[pl.BlockSpec((1, 1, c_out), lambda b, t: (b, 0, 0)),
                       pl.BlockSpec((1, 1, c_out), lambda b, t: (b, 0, 0))],
        ),
        compiler_params=pltpu.CompilerParams(
            dimension_semantics=("parallel", "arbitrary")),
    )(x_padded, w_mat)

    # ---- glue: reduce partial stats -> fused BN scale/shift (tiny, f32) --------------
    ch_sum = jnp.sum(psum[:, 0, :], axis=0)                    # (C_out,)
    ch_ssq = jnp.sum(pssq[:, 0, :], axis=0)
    mean = ch_sum / m
    var = jnp.maximum(ch_ssq / m - mean * mean, 0.0)           # biased var (PyTorch train)
    inv_std = jax.lax.rsqrt(var + eps)
    g = gamma.astype(jnp.float32)
    scale = (g * inv_std).reshape(1, c_out)
    shift = (beta.astype(jnp.float32) - mean * g * inv_std).reshape(1, c_out)

    # ---- Pallas call 2: recompute conv fused with BN + ReLU, write final output -----
    bnrelu_kernel = functools.partial(_conv_bn_relu_kernel, tile_h=tile_h, w_out=w_out,
                                      stride=stride, kh=kh, kw=kw)
    out = pl.pallas_call(
        bnrelu_kernel,
        out_shape=jax.ShapeDtypeStruct((n, hw, c_out), jnp.float32),
        grid_spec=pltpu.PrefetchScalarGridSpec(
            num_scalar_prefetch=0,
            grid=(n, n_tiles),
            in_specs=[x_spec, w_spec,
                      pl.BlockSpec((1, c_out), lambda b, t: (0, 0)),
                      pl.BlockSpec((1, c_out), lambda b, t: (0, 0))],
            out_specs=pl.BlockSpec((1, tile_rows, c_out), lambda b, t: (b, t, 0)),
        ),
        compiler_params=pltpu.CompilerParams(
            dimension_semantics=("parallel", "parallel")),
    )(x_padded, w_mat, scale, shift)

    # ---- glue: (N, H*W, C_out) -> NCHW ------------------------------------------------
    out = out.reshape(n, h_out, w_out, c_out)
    return jnp.transpose(out, (0, 3, 1, 2))


if __name__ == "__main__":
    # ConvBlock(in_channels=4, out_channels=8, kernel_size=3, stride=1, padding=1)
    N, C_IN, H, W = 2, 4, 16, 16
    C_OUT, KH, KW = 8, 3, 3
    STRIDE, PADDING = 1, 1

    key = jax.random.PRNGKey(0)
    kx, kw_, kb = jax.random.split(key, 3)

    x = jax.random.normal(kx, (N, C_IN, H, W), dtype=jnp.float32)
    fan_in = C_IN * KH * KW
    bound = 1.0 / (fan_in ** 0.5)
    conv_w = jax.random.uniform(kw_, (C_OUT, C_IN, KH, KW),
                                minval=-bound, maxval=bound, dtype=jnp.float32)
    conv_b = jax.random.uniform(kb, (C_OUT,),
                                minval=-bound, maxval=bound, dtype=jnp.float32)
    bn_gamma = jnp.ones((C_OUT,), jnp.float32)   # BatchNorm2d default weight
    bn_beta = jnp.zeros((C_OUT,), jnp.float32)   # BatchNorm2d default bias

    out = conv_block_forward(x, conv_w, conv_b, bn_gamma, bn_beta,
                             stride=STRIDE, padding=PADDING)
    jax.block_until_ready(out)

    # f32 reference (Conv2d + train-mode BatchNorm2d + ReLU).  The conv bias is applied
    # here and cancels in BN, validating the bias-elimination in the kernel path.
    yr = jax.lax.conv_general_dilated(
        x, conv_w, window_strides=(STRIDE, STRIDE),
        padding=[(PADDING, PADDING), (PADDING, PADDING)],
        dimension_numbers=("NCHW", "OIHW", "NCHW"))
    yr = yr + conv_b.reshape(1, -1, 1, 1)
    mu = jnp.mean(yr, axis=(0, 2, 3), keepdims=True)
    var = jnp.mean((yr - mu) ** 2, axis=(0, 2, 3), keepdims=True)
    ref = jnp.maximum(bn_gamma.reshape(1, -1, 1, 1) * (yr - mu)
                      * jax.lax.rsqrt(var + 1e-5)
                      + bn_beta.reshape(1, -1, 1, 1), 0.0)

    assert out.shape == (N, C_OUT, H, W), out.shape
    assert out.dtype == jnp.float32
    assert bool(jnp.all(out >= 0.0))                      # ReLU
    max_err = float(jnp.max(jnp.abs(out - ref)))
    assert max_err < 5e-2, f"max abs error {max_err}"     # bf16-matmul tolerance
    print("KERNEL_OK")
</pallas_src>

<mosaic_0001>
module attributes {stable_mosaic.version = 11 : i64} {
  func.func @_conv_stats_kernel(%arg0: i32, %arg1: i32, %arg2: memref<1x18x18x4xbf16, #tpu.memory_space<vmem>>, %arg3: memref<36x8xbf16, #tpu.memory_space<vmem>>, %arg4: memref<1x1x8xf32, #tpu.memory_space<vmem>>, %arg5: memref<1x1x8xf32, #tpu.memory_space<vmem>>) attributes {dimension_semantics = [#tpu.dimension_semantics<parallel>, #tpu.dimension_semantics<arbitrary>], iteration_bounds = array<i64: 2, 2>, scalar_prefetch = 0 : i64, scratch_operands = 0 : i64, tpu.core_type = #tpu.core_type<tc>, window_params = [{transform_indices = @transform_0, window_bounds = array<i64: 1, 18, 18, 4>}, {pipeline_mode = #tpu.pipeline_mode<synchronous>, transform_indices = @transform_1, window_bounds = array<i64: 36, 8>}, {transform_indices = @transform_2, window_bounds = array<i64: 1, 1, 8>}, {transform_indices = @transform_3, window_bounds = array<i64: 1, 1, 8>}]} {
    %c0_i32 = arith.constant 0 : i32
    %0 = arith.cmpi eq, %arg1, %c0_i32 : i32
    %1 = arith.extui %0 : i1 to i32
    %c0_i32_0 = arith.constant 0 : i32
    %2 = arith.cmpi ne, %1, %c0_i32_0 : i32
    scf.if %2 {
      %cst_19 = arith.constant 0.000000e+00 : f32
      %39 = vector.broadcast %cst_19 : f32 to vector<1x1x8xf32>
      %c0_20 = arith.constant 0 : index
      %c0_21 = arith.constant 0 : index
      %c0_22 = arith.constant 0 : index
      %40 = vector.load %arg4[%c0_20, %c0_21, %c0_22] : memref<1x1x8xf32, #tpu.memory_space<vmem>>, vector<1x1x8xf32>
      tpu.vector_store %arg4[%c0_20, %c0_21, %c0_22], %39 {strides = array<i32>} : memref<1x1x8xf32, #tpu.memory_space<vmem>>, vector<1x1x8xf32>,
      %cst_23 = arith.constant 0.000000e+00 : f32
      %41 = vector.broadcast %cst_23 : f32 to vector<1x1x8xf32>
      %c0_24 = arith.constant 0 : index
      %c0_25 = arith.constant 0 : index
      %c0_26 = arith.constant 0 : index
      %42 = vector.load %arg5[%c0_24, %c0_25, %c0_26] : memref<1x1x8xf32, #tpu.memory_space<vmem>>, vector<1x1x8xf32>
      tpu.vector_store %arg5[%c0_24, %c0_25, %c0_26], %41 {strides = array<i32>} : memref<1x1x8xf32, #tpu.memory_space<vmem>>, vector<1x1x8xf32>,
    } else {
    }
    %c8_i32 = arith.constant 8 : i32
    %3 = arith.muli %arg1, %c8_i32 : i32
    %c1_i32 = arith.constant 1 : i32
    %4 = arith.muli %3, %c1_i32 : i32
    %5 = tpu.assume_multiple %4, 8 : i32
    %c0 = arith.constant 0 : index
    %6 = arith.index_cast %5 : i32 to index
    %c0_1 = arith.constant 0 : index
    %c0_2 = arith.constant 0 : index
    %7 = vector.load %arg2[%c0, %6, %c0_1, %c0_2] : memref<1x18x18x4xbf16, #tpu.memory_space<vmem>>, vector<1x10x18x4xbf16>
    %8 = vector.shape_cast %7 : vector<1x10x18x4xbf16> to vector<10x18x4xbf16>
    %9 = vector.extract_strided_slice %8 {offsets = [0, 0, 0], sizes = [8, 16, 4], strides = [1, 1, 1]} : vector<10x18x4xbf16> to vector<8x16x4xbf16>
    %10 = vector.extract_strided_slice %8 {offsets = [0, 1, 0], sizes = [8, 16, 4], strides = [1, 1, 1]} : vector<10x18x4xbf16> to vector<8x16x4xbf16>
    %11 = vector.extract_strided_slice %8 {offsets = [0, 2, 0], sizes = [8, 16, 4], strides = [1, 1, 1]} : vector<10x18x4xbf16> to vector<8x16x4xbf16>
    %12 = vector.extract_strided_slice %8 {offsets = [1, 0, 0], sizes = [8, 16, 4], strides = [1, 1, 1]} : vector<10x18x4xbf16> to vector<8x16x4xbf16>
    %13 = vector.extract_strided_slice %8 {offsets = [1, 1, 0], sizes = [8, 16, 4], strides = [1, 1, 1]} : vector<10x18x4xbf16> to vector<8x16x4xbf16>
    %14 = vector.extract_strided_slice %8 {offsets = [1, 2, 0], sizes = [8, 16, 4], strides = [1, 1, 1]} : vector<10x18x4xbf16> to vector<8x16x4xbf16>
    %15 = vector.extract_strided_slice %8 {offsets = [2, 0, 0], sizes = [8, 16, 4], strides = [1, 1, 1]} : vector<10x18x4xbf16> to vector<8x16x4xbf16>
    %16 = vector.extract_strided_slice %8 {offsets = [2, 1, 0], sizes = [8, 16, 4], strides = [1, 1, 1]} : vector<10x18x4xbf16> to vector<8x16x4xbf16>
    %17 = vector.extract_strided_slice %8 {offsets = [2, 2, 0], sizes = [8, 16, 4], strides = [1, 1, 1]} : vector<10x18x4xbf16> to vector<8x16x4xbf16>
    %18 = tpu.concatenate %9, %10, %11, %12, %13, %14, %15, %16, %17 in 2 : vector<8x16x4xbf16>, vector<8x16x4xbf16>, vector<8x16x4xbf16>, vector<8x16x4xbf16>, vector<8x16x4xbf16>, vector<8x16x4xbf16>, vector<8x16x4xbf16>, vector<8x16x4xbf16>, vector<8x16x4xbf16> -> vector<8x16x36xbf16>
    %19 = vector.shape_cast %18 : vector<8x16x36xbf16> to vector<128x36xbf16>
    %c0_3 = arith.constant 0 : index
    %c0_4 = arith.constant 0 : index
    %20 = vector.load %arg3[%c0_3, %c0_4] : memref<36x8xbf16, #tpu.memory_space<vmem>>, vector<36x8xbf16>
    %cst = arith.constant dense<0.000000e+00> : vector<128x8xf32>
    %21 = tpu.matmul %19, %20, %cst {dimension_numbers = #tpu.dot_dimension_numbers<[1], [0], [0], [1], [0, 0, 1, 1], [], []>} : vector<128x36xbf16>, vector<36x8xbf16>, vector<128x8xf32> -> vector<128x8xf32>
    %c0_5 = arith.constant 0 : index
    %c0_6 = arith.constant 0 : index
    %c0_7 = arith.constant 0 : index
    %22 = vector.load %arg4[%c0_5, %c0_6, %c0_7] : memref<1x1x8xf32, #tpu.memory_space<vmem>>, vector<1x1x8xf32>
    %23 = vector.shape_cast %22 : vector<1x1x8xf32> to vector<1x8xf32>
    %cst_8 = arith.constant dense<0.000000e+00> : vector<8xf32>
    %24 = vector.multi_reduction <add>, %21, %cst_8 [0] : vector<128x8xf32> to vector<8xf32>
    %25 = vector.shape_cast %24 : vector<8xf32> to vector<1x8xf32>
    %26 = arith.addf %23, %25 : vector<1x8xf32>
    %c0_9 = arith.constant 0 : index
    %c0_10 = arith.constant 0 : index
    %c0_11 = arith.constant 0 : index
    %27 = vector.load %arg4[%c0_9, %c0_10, %c0_11] : memref<1x1x8xf32, #tpu.memory_space<vmem>>, vector<1x1x8xf32>
    %28 = vector.shape_cast %27 : vector<1x1x8xf32> to vector<1x8xf32>
    %29 = vector.shape_cast %26 : vector<1x8xf32> to vector<1x1x8xf32>
    tpu.vector_store %arg4[%c0_9, %c0_10, %c0_11], %29 {strides = array<i32>} : memref<1x1x8xf32, #tpu.memory_space<vmem>>, vector<1x1x8xf32>,
    %c0_12 = arith.constant 0 : index
    %c0_13 = arith.constant 0 : index
    %c0_14 = arith.constant 0 : index
    %30 = vector.load %arg5[%c0_12, %c0_13, %c0_14] : memref<1x1x8xf32, #tpu.memory_space<vmem>>, vector<1x1x8xf32>
    %31 = vector.shape_cast %30 : vector<1x1x8xf32> to vector<1x8xf32>
    %32 = arith.mulf %21, %21 : vector<128x8xf32>
    %cst_15 = arith.constant dense<0.000000e+00> : vector<8xf32>
    %33 = vector.multi_reduction <add>, %32, %cst_15 [0] : vector<128x8xf32> to vector<8xf32>
    %34 = vector.shape_cast %33 : vector<8xf32> to vector<1x8xf32>
    %35 = arith.addf %31, %34 : vector<1x8xf32>
    %c0_16 = arith.constant 0 : index
    %c0_17 = arith.constant 0 : index
    %c0_18 = arith.constant 0 : index
    %36 = vector.load %arg5[%c0_16, %c0_17, %c0_18] : memref<1x1x8xf32, #tpu.memory_space<vmem>>, vector<1x1x8xf32>
    %37 = vector.shape_cast %36 : vector<1x1x8xf32> to vector<1x8xf32>
    %38 = vector.shape_cast %35 : vector<1x8xf32> to vector<1x1x8xf32>
    tpu.vector_store %arg5[%c0_16, %c0_17, %c0_18], %38 {strides = array<i32>} : memref<1x1x8xf32, #tpu.memory_space<vmem>>, vector<1x1x8xf32>,
    return
  }
  func.func @transform_0(%arg0: i32, %arg1: i32) -> (i32, i32, i32, i32) {
    %c0_i32 = arith.constant 0 : i32
    %c0_i32_0 = arith.constant 0 : i32
    %c0_i32_1 = arith.constant 0 : i32
    %c0_i32_2 = arith.constant 0 : i32
    return %arg0, %c0_i32, %c0_i32_0, %c0_i32_1 : i32, i32, i32, i32
  }
  func.func @transform_1(%arg0: i32, %arg1: i32) -> (i32, i32) {
    %c0_i32 = arith.constant 0 : i32
    %c0_i32_0 = arith.constant 0 : i32
    %c0_i32_1 = arith.constant 0 : i32
    return %c0_i32, %c0_i32_0 : i32, i32
  }
  func.func @transform_2(%arg0: i32, %arg1: i32) -> (i32, i32, i32) {
    %c0_i32 = arith.constant 0 : i32
    %c0_i32_0 = arith.constant 0 : i32
    %c0_i32_1 = arith.constant 0 : i32
    return %arg0, %c0_i32, %c0_i32_0 : i32, i32, i32
  }
  func.func @transform_3(%arg0: i32, %arg1: i32) -> (i32, i32, i32) {
    %c0_i32 = arith.constant 0 : i32
    %c0_i32_0 = arith.constant 0 : i32
    %c0_i32_1 = arith.constant 0 : i32
    return %arg0, %c0_i32, %c0_i32_0 : i32, i32, i32
  }
}

module attributes {stable_mosaic.version = 11 : i64} {
  func.func @_conv_bn_relu_kernel(%arg0: i32, %arg1: i32, %arg2: memref<1x18x18x4xbf16, #tpu.memory_space<vmem>>, %arg3: memref<36x8xbf16, #tpu.memory_space<vmem>>, %arg4: memref<1x8xf32, #tpu.memory_space<vmem>>, %arg5: memref<1x8xf32, #tpu.memory_space<vmem>>, %arg6: memref<1x128x8xf32, #tpu.memory_space<vmem>>) attributes {dimension_semantics = [#tpu.dimension_semantics<parallel>, #tpu.dimension_semantics<parallel>], iteration_bounds = array<i64: 2, 2>, scalar_prefetch = 0 : i64, scratch_operands = 0 : i64, tpu.core_type = #tpu.core_type<tc>, window_params = [{transform_indices = @transform_0, window_bounds = array<i64: 1, 18, 18, 4>}, {pipeline_mode = #tpu.pipeline_mode<synchronous>, transform_indices = @transform_1, window_bounds = array<i64: 36, 8>}, {pipeline_mode = #tpu.pipeline_mode<synchronous>, transform_indices = @transform_2, window_bounds = array<i64: 1, 8>}, {pipeline_mode = #tpu.pipeline_mode<synchronous>, transform_indices = @transform_3, window_bounds = array<i64: 1, 8>}, {transform_indices = @transform_4, window_bounds = array<i64: 1, 128, 8>}]} {
    %c8_i32 = arith.constant 8 : i32
    %0 = arith.muli %arg1, %c8_i32 : i32
    %c1_i32 = arith.constant 1 : i32
    %1 = arith.muli %0, %c1_i32 : i32
    %2 = tpu.assume_multiple %1, 8 : i32
    %c0 = arith.constant 0 : index
    %3 = arith.index_cast %2 : i32 to index
    %c0_0 = arith.constant 0 : index
    %c0_1 = arith.constant 0 : index
    %4 = vector.load %arg2[%c0, %3, %c0_0, %c0_1] : memref<1x18x18x4xbf16, #tpu.memory_space<vmem>>, vector<1x10x18x4xbf16>
    %5 = vector.shape_cast %4 : vector<1x10x18x4xbf16> to vector<10x18x4xbf16>
    %6 = vector.extract_strided_slice %5 {offsets = [0, 0, 0], sizes = [8, 16, 4], strides = [1, 1, 1]} : vector<10x18x4xbf16> to vector<8x16x4xbf16>
    %7 = vector.extract_strided_slice %5 {offsets = [0, 1, 0], sizes = [8, 16, 4], strides = [1, 1, 1]} : vector<10x18x4xbf16> to vector<8x16x4xbf16>
    %8 = vector.extract_strided_slice %5 {offsets = [0, 2, 0], sizes = [8, 16, 4], strides = [1, 1, 1]} : vector<10x18x4xbf16> to vector<8x16x4xbf16>
    %9 = vector.extract_strided_slice %5 {offsets = [1, 0, 0], sizes = [8, 16, 4], strides = [1, 1, 1]} : vector<10x18x4xbf16> to vector<8x16x4xbf16>
    %10 = vector.extract_strided_slice %5 {offsets = [1, 1, 0], sizes = [8, 16, 4], strides = [1, 1, 1]} : vector<10x18x4xbf16> to vector<8x16x4xbf16>
    %11 = vector.extract_strided_slice %5 {offsets = [1, 2, 0], sizes = [8, 16, 4], strides = [1, 1, 1]} : vector<10x18x4xbf16> to vector<8x16x4xbf16>
    %12 = vector.extract_strided_slice %5 {offsets = [2, 0, 0], sizes = [8, 16, 4], strides = [1, 1, 1]} : vector<10x18x4xbf16> to vector<8x16x4xbf16>
    %13 = vector.extract_strided_slice %5 {offsets = [2, 1, 0], sizes = [8, 16, 4], strides = [1, 1, 1]} : vector<10x18x4xbf16> to vector<8x16x4xbf16>
    %14 = vector.extract_strided_slice %5 {offsets = [2, 2, 0], sizes = [8, 16, 4], strides = [1, 1, 1]} : vector<10x18x4xbf16> to vector<8x16x4xbf16>
    %15 = tpu.concatenate %6, %7, %8, %9, %10, %11, %12, %13, %14 in 2 : vector<8x16x4xbf16>, vector<8x16x4xbf16>, vector<8x16x4xbf16>, vector<8x16x4xbf16>, vector<8x16x4xbf16>, vector<8x16x4xbf16>, vector<8x16x4xbf16>, vector<8x16x4xbf16>, vector<8x16x4xbf16> -> vector<8x16x36xbf16>
    %16 = vector.shape_cast %15 : vector<8x16x36xbf16> to vector<128x36xbf16>
    %c0_2 = arith.constant 0 : index
    %c0_3 = arith.constant 0 : index
    %17 = vector.load %arg3[%c0_2, %c0_3] : memref<36x8xbf16, #tpu.memory_space<vmem>>, vector<36x8xbf16>
    %cst = arith.constant dense<0.000000e+00> : vector<128x8xf32>
    %18 = tpu.matmul %16, %17, %cst {dimension_numbers = #tpu.dot_dimension_numbers<[1], [0], [0], [1], [0, 0, 1, 1], [], []>} : vector<128x36xbf16>, vector<36x8xbf16>, vector<128x8xf32> -> vector<128x8xf32>
    %c0_4 = arith.constant 0 : index
    %c0_5 = arith.constant 0 : index
    %19 = vector.load %arg4[%c0_4, %c0_5] : memref<1x8xf32, #tpu.memory_space<vmem>>, vector<1x8xf32>
    %20 = vector.broadcast %19 : vector<1x8xf32> to vector<128x8xf32>
    %21 = arith.mulf %18, %20 : vector<128x8xf32>
    %c0_6 = arith.constant 0 : index
    %c0_7 = arith.constant 0 : index
    %22 = vector.load %arg5[%c0_6, %c0_7] : memref<1x8xf32, #tpu.memory_space<vmem>>, vector<1x8xf32>
    %23 = vector.broadcast %22 : vector<1x8xf32> to vector<128x8xf32>
    %24 = arith.addf %21, %23 : vector<128x8xf32>
    %cst_8 = arith.constant 0.000000e+00 : f32
    %25 = vector.broadcast %cst_8 : f32 to vector<128x8xf32>
    %26 = arith.maximumf %24, %25 : vector<128x8xf32>
    %c0_9 = arith.constant 0 : index
    %c0_10 = arith.constant 0 : index
    %c0_11 = arith.constant 0 : index
    %27 = vector.load %arg6[%c0_9, %c0_10, %c0_11] : memref<1x128x8xf32, #tpu.memory_space<vmem>>, vector<1x128x8xf32>
    %28 = vector.shape_cast %27 : vector<1x128x8xf32> to vector<128x8xf32>
    %29 = vector.shape_cast %26 : vector<128x8xf32> to vector<1x128x8xf32>
    tpu.vector_store %arg6[%c0_9, %c0_10, %c0_11], %29 {strides = array<i32>} : memref<1x128x8xf32, #tpu.memory_space<vmem>>, vector<1x128x8xf32>,
    return
  }
  func.func @transform_0(%arg0: i32, %arg1: i32) -> (i32, i32, i32, i32) {
    %c0_i32 = arith.constant 0 : i32
    %c0_i32_0 = arith.constant 0 : i32
    %c0_i32_1 = arith.constant 0 : i32
    %c0_i32_2 = arith.constant 0 : i32
    return %arg0, %c0_i32, %c0_i32_0, %c0_i32_1 : i32, i32, i32, i32
  }
  func.func @transform_1(%arg0: i32, %arg1: i32) -> (i32, i32) {
    %c0_i32 = arith.constant 0 : i32
    %c0_i32_0 = arith.constant 0 : i32
    %c0_i32_1 = arith.constant 0 : i32
    return %c0_i32, %c0_i32_0 : i32, i32
  }
  func.func @transform_2(%arg0: i32, %arg1: i32) -> (i32, i32) {
    %c0_i32 = arith.constant 0 : i32
    %c0_i32_0 = arith.constant 0 : i32
    %c0_i32_1 = arith.constant 0 : i32
    return %c0_i32, %c0_i32_0 : i32, i32
  }
  func.func @transform_3(%arg0: i32, %arg1: i32) -> (i32, i32) {
    %c0_i32 = arith.constant 0 : i32
    %c0_i32_0 = arith.constant 0 : i32
    %c0_i32_1 = arith.constant 0 : i32
    return %c0_i32, %c0_i32_0 : i32, i32
  }
  func.func @transform_4(%arg0: i32, %arg1: i32) -> (i32, i32, i32) {
    %c0_i32 = arith.constant 0 : i32
    %c0_i32_0 = arith.constant 0 : i32
    return %arg0, %arg1, %c0_i32 : i32, i32, i32
  }
}

</mosaic_0001>

<bundles_post_ra>
// kernel: conv_block_forward.2
= control target key start
LH: loop header
LB: loop body
LE: loop exit
PB: predicated region body
PF: predicated region fallthrough
CT: control target
= control target key end

     0   :  { %s1273_s12 = smov 0   ;;  %s1275_s13 = smov 0   ;;  %s1687_s0 = inlined_call_operand.vmem [shape: bf16[2,18,18,4], index: 0, kind: input, shape index: {}]   ;;  %s1688_s1 = inlined_call_operand.vmem [shape: bf16[36,8], index: 1, kind: input, shape index: {}]   ;;  %s1689_s2 = inlined_call_operand.vmem [shape: f32[2,1,8], index: 2, kind: output, shape index: {0}]   ;;  %s1690_s3 = inlined_call_operand.vmem [shape: f32[2,1,8], index: 3, kind: output, shape index: {1}]  }
   0x1   :  { %s1277_s14 = smov 0   ;;  %s1279_s15 = smov 0  }
   0x2   :  { %s1281_s16 = smov 0  }
   0x3 LB: > { %s23_s17 = sadd.s32 1, %s1234_s14  ;;  %s26_s18 = sadd.s32 1, %s1238_s15  ;;  %s1242_s16 = sphi %s1281_s16, %s14_s16   ;;  %s1238_s15 = sphi %s1279_s15, %s1694_s15   ;;  %s1234_s14 = sphi %s1277_s14, %s1693_s14   ;;  %s1230_s13 = sphi %s1275_s13, %s1692_s13   ;;  %s1226_s12 = sphi %s1273_s12, %s1691_s12  }
   0x4   : > { %p24_p0 = scmp.ge.s32.totalorder %s23_s17, 2  ;;  %p1050_p1 = scmp.ge.s32.totalorder %s1242_s16, 1 }
   0x5   : > { %p152_p2 = scmp.lt.s32.totalorder %s1242_s16, 5 }
   0x6   : > { %s1696_s17 = smov (%p24_p0, %s23_s17), 0  ;;  %s1698_s18 = smov (!%p24_p0, %s26_s18), %s1238_s15 }
   0x7   : > { %p153_p3 = pnand %p1050_p1, %p152_p2  ;;  %p28_p4 = scmp.ge.s32.totalorder %s1698_s18, 2 }
   0x8   : > { %p177_p5 = scmp.lt.s32.totalorder (!%p153_p3), %s1230_s13, 1  ;;  %p1052_p6 = scmp.ne.s32.totalorder (!%p153_p3), %s1226_s12, 0 }
   0x9   : > { %s1700_s18 = smov (%p28_p4, %s1698_s18), 0  ;;  %156 = sbr.rel (%p153_p3) target bundleno = 512 (0x200), region = 28 }
  0x10   : > { %s1702_s13 = smov (!%p177_p5, %s1230_s13), 1  ;;  %192 = sbr.rel (%p1052_p6) target bundleno = 23 (0x17), region = 32 }
  0x11   : > { %s1131_s19 = smul.u32 216, %s1702_s13  ;;  %s1308_s22 = scalar_lea.vmem %s1689_s2, %s1702_s13  ;;  %vm193_vm0 = vcmask (!%p1052_p6), 57344   ;;  %v1244_v0 = vmov (!%p1052_p6), 0.0  }
  0x12   : > { %s1313_s25 = scalar_lea.vmem %s1690_s3, %s1702_s13  ;;  %194 = vst.msk [vmem:[%s1308_s22] sm:$0x1] (!%p1052_p6), %vm193_vm0, %v1244_v0 }
  0x13   : > { %s181_s28 = scalar_lea.vmem %s1687_s0, %s1131_s19  ;;  %195 = vst.msk [vmem:[%s1313_s25] sm:$0x1] (!%p1052_p6), %vm193_vm0, %v1244_v0 }
  0x17 PF: > { %s1089_s29 = smul.u32 96, %s1226_s12  ;;  %vm407_vm1 = vcmask 1046528   ;;  %s1245_s4 = smov 12   ;;  %vm294_vm2 = vsmask.f32 7424  ;;  %vm763_vm3 = vcmask 1041408  }
  0x18   : > { %s1246_s5 = smov 8   ;;  %s1247_s6 = smov 4   ;;  %vm590_vm4 = vcmask 31744   ;;  %vm607_vm5 = vcmask 64512   ;;  %vm624_vm6 = vcmask 97280   ;;  %vm641_vm7 = vcmask 130048  }
  0x19   : > { %s1322_s30 = scalar_lea.vmem %s181_s28, %s1089_s29  ;;  %s1248_s7 = smov 16   ;;  %vm658_vm8 = vcmask 162816   ;;  %vm675_vm9 = vcmask 195584   ;;  %vm709_vm10 = vcmask 261120   ;;  %vm692_vm11 = vcmask 228352  }
  0x1a   : > { %v1325_v1 = vld [vmem:[%s1322_s30 + $0x18] sm:$0xff]   ;;  %v1328_v2 = vld [vmem:[%s1322_s30 + $0xc] sm:$0xff]   ;;  %v1335_v3 = vld [vmem:[%s1322_s30] sm:$0xff]   ;;  %s1249_s8 = smov 20   ;;  %s1250_s9 = smov 24   ;;  %vm746_vm12 = vcmask 293888  }
  0x1b   : > { %455 = vrot.lane.b32.xlu1 %v1325_v1, %s1245_s4  ;;  %453 = vrot.lane.b32.xlu0 %v1328_v2, %s1245_s4  ;;  %v1184_v4 = vld [vmem:[%s1322_s30 + $0x8] ss:$0 sps:$4 sm:$0x11]   ;;  %v1185_v5 = vld [vmem:[%s1322_s30 + $0x14] ss:$0 sps:$4 sm:$0x11]  }
  0x1c   : > { %v411_v6 = vrot.slane %v1328_v2, 1  ;;  %v308_v7 = vshrl.u32 %v1328_v2, 16  ;;  %v310_v8 = vshll.u32 %v1328_v2, 16  ;;  %v408_v9 = vrot.slane %v1335_v3, 1  ;;  %v1352_v29 = vld [vmem:[%s1322_s30 + $0x24] sm:$0xff]   ;;  %v1378_v44 = vld [vmem:[%s1322_s30 + $0x54] sm:$0xff]  }
  0x1d   : > { %v409_v10 = vrot.slane %v1184_v4, 1  ;;  %v296_v11 = vshrl.u32 %v1335_v3, 16  ;;  %v298_v12 = vshll.u32 %v1335_v3, 16  ;;  %v303_v13 = vshll.u32 %v1184_v4, 16  ;;  %v1375_v43 = vld [vmem:[%s1322_s30 + $0x48] sm:$0xff]   ;;  %v1381_v45 = vld [vmem:[%s1322_s30 + $0x60] sm:$0xff]  }
  0x1e   : > { %v412_v14 = vrot.slane %v1185_v5, 1  ;;  %v312_v15 = vrot.slane %v310_v8, 1  ;;  %v315_v16 = vshll.u32 %v1185_v5, 16  ;;  %v1186_v19 = vld [vmem:[%s1322_s30 + $0x20] ss:$0 sps:$4 sm:$0x11]  }
  0x1f   : > { %v410_v17 = vsel %vm407_vm1, %v408_v9, %v409_v10  ;;  %v300_v18 = vrot.slane %v298_v12, 1  ;;  %v320_v20 = vshrl.u32 %v1325_v1, 16  ;;  %v322_v21 = vshll.u32 %v1325_v1, 16  ;;  %v1359_v34 = vld [vmem:[%s1322_s30 + $0x2c] ss:$0 sps:$4 sm:$0x11]  }
  0x20   : > { %432 = vrot.lane.b32.xlu1 %v410_v17, %s1246_s5  ;;  %v305_v22 = vrot.slane %v303_v13, 1  ;;  %v413_v23 = vsel %vm407_vm1, %v411_v6, %v412_v14  ;;  %v313_v24 = vor.u32 %v312_v15, %v308_v7  ;;  %v317_v26 = vrot.slane %v315_v16, 1  ;;  %v1194_v46 = vld [vmem:[%s1322_s30 + $0x50] ss:$0 sps:$4 sm:$0x11]   ;;  %s1251_s10 = smov 28  }
  0x21   : > { %v301_v25 = vor.u32 %v300_v18, %v296_v11  ;;  %v324_v27 = vrot.slane %v322_v21, 1  ;;  %v327_v28 = vshll.u32 %v1186_v19, 16  ;;  %v414_v33 = vrot.slane %v1325_v1, 1  ;;  %v1392_v56 = vld [vmem:[%s1322_s30 + $0x6c] sm:$0xff]   ;;  %s1252_s23 = smov 32  }
  0x22   : > { %v318_v35 = vsel %vm294_vm2, %v313_v24, %v317_v26  ;;  %v415_v37 = vrot.slane %v1186_v19, 1  ;;  %v334_v38 = vshll.u32 %v1352_v29, 16  ;;  %v339_v39 = vshll.u32 %v1359_v34, 16  ;;  %v1196_v57 = vld [vmem:[%s1322_s30 + $0x5c] ss:$0 sps:$4 sm:$0x11]  }
  0x23   : > { %v306_v30 = vsel %vm294_vm2, %v301_v25, %v305_v22  ;;  %v325_v31 = vor.u32 %v324_v27, %v320_v20  ;;  %v329_v32 = vrot.slane %v327_v28, 1  ;;  %v332_v41 = vshrl.u32 %v1352_v29, 16  ;;  %v1198_v10 = vld [vmem:[%s1322_s30 + $0x68] ss:$0 sps:$4 sm:$0x11]   ;;  %v1418_v16 = vld [vmem:[%s1322_s30 + $0x30] sm:$0xff]  }
  0x24   : > { %391 = vrot.lane.b32.xlu0 %v306_v30, %s1247_s6  ;;  %434 = vrot.lane.b32.xlu1 %v413_v23, %s1246_s5  ;;  %v1371_v40 = vsel %vm407_vm1, %v414_v33, %v415_v37  ;;  %v336_v42 = vrot.slane %v334_v38, 1  ;;  %v368_v47 = vshrl.u32 %v1375_v43, 16  ;;  %v370_v48 = vshll.u32 %v1375_v43, 16  ;;  %v1200_v20 = vld [vmem:[%s1322_s30 + $0x74] ss:$0 sps:$4 sm:$0x11]  }
  0x25   : > { %v1363_v36 = vsel %vm294_vm2, %v325_v31, %v329_v32  ;;  %v426_v49 = vrot.slane %v1375_v43, 1  ;;  %v341_v50 = vrot.slane %v339_v39, 1  ;;  %v380_v51 = vshrl.u32 %v1378_v44, 16  ;;  %v1201_v24 = vld [vmem:[%s1688_s1] sm:$0xff]   ;;  %v1202_v30 = vld [vmem:[%s1688_s1 + $0x8] sm:$0xff]  }
  0x26   : > { %v337_v52 = vor.u32 %v336_v42, %v332_v41  ;;  %v372_v53 = vrot.slane %v370_v48, 1  ;;  %v375_v54 = vshll.u32 %v1194_v46, 16  ;;  %v427_v55 = vrot.slane %v1194_v46, 1  ;;  %1101 = vmatprep.subr.bf16.mxu0 %v1201_v24  ;;  %1123 = vmatprep.subr.bf16.mxu1 %v1201_v24  ;;  %v1203_v39 = vld [vmem:[%s1688_s1 + $0x10] ss:$0 sps:$4 sm:$0x33]  }
  0x27   : > { %v382_v58 = vshll.u32 %v1378_v44, 16  ;;  %v429_v59 = vrot.slane %v1378_v44, 1  ;;  %v473_v60 = vshrl.u32 %v1381_v45, 16  ;;  %v475_v0 = vshll.u32 %v1381_v45, 16  ;;  %1102 = vmatpush3.bf16.msra.mxu0 %v1201_v24  ;;  %1126 = vmatpush3.bf16.msra.mxu1 %v1201_v24 }
  0x28   : > { %393 = vrot.lane.b32.xlu0 %v318_v35, %s1247_s6  ;;  %486 = vrot.lane.b32.xlu1 %v1363_v36, %s1248_s7  ;;  %v373_v61 = vor.u32 %v372_v53, %v368_v47  ;;  %v377_v62 = vrot.slane %v375_v54, 1  ;;  %v1399_v63 = vsel %vm407_vm1, %v426_v49, %v427_v55  ;;  %v387_v5 = vshll.u32 %v1196_v57, 16  ;;  %v1190_v42 = vld [vmem:[%s1322_s30 + $0x38] ss:$0 sps:$4 sm:$0x11]   ;;  %v1468_v53 = vld [vmem:[%s1322_s30 + $0x3c] sm:$0xff]  }
  0x29   : > { %v384_v4 = vrot.slane %v382_v58, 1  ;;  %v430_v6 = vrot.slane %v1196_v57, 1  ;;  %v500_v7 = vrot.slane %v1381_v45, 1  ;;  %v1407_v8 = vsel %vm294_vm2, %v337_v52, %v341_v50  ;;  %1103 = vmatprep.subr.bf16.mxu0 %v1202_v30  ;;  %1124 = vmatprep.subr.bf16.mxu1 %v1202_v30  ;;  %v1192_v58 = vld [vmem:[%s1322_s30 + $0x44] ss:$0 sps:$4 sm:$0x11]  }
  0x2a   : > { %v1410_v9 = vsel %vm294_vm2, %v373_v61, %v377_v62  ;;  %v477_v11 = vrot.slane %v475_v0, 1  ;;  %v389_v13 = vrot.slane %v387_v5, 1  ;;  %v544_v15 = vshrl.u32 %v1392_v56, 16 }
  0x2b   : > { %v385_v12 = vor.u32 %v384_v4, %v380_v51  ;;  %v1414_v14 = vsel %vm407_vm1, %v429_v59, %v430_v6  ;;  %v480_v18 = vshll.u32 %v1198_v10, 16  ;;  %v501_v19 = vrot.slane %v1198_v10, 1  ;;  %1104 = vmatpush3.bf16.msra.mxu0 %v1202_v30  ;;  %1127 = vmatpush3.bf16.msra.mxu1 %v1202_v30 }
  0x2c   : > { %484 = vrot.lane.b32.xlu0 %v318_v35, %s1248_s7  ;;  %505 = vrot.lane.b32.xlu1 %v1371_v40, %s1249_s8  ;;  %v478_v17 = vor.u32 %v477_v11, %v473_v60  ;;  %v546_v21 = vshll.u32 %v1392_v56, 16  ;;  %v551_v28 = vshll.u32 %v1200_v20, 16  ;;  %v572_v31 = vrot.slane %v1200_v20, 1 }
  0x2d   : > { %v1427_v22 = vsel %vm294_vm2, %v385_v12, %v389_v13  ;;  %v482_v25 = vrot.slane %v480_v18, 1  ;;  %v1434_v26 = vsel %vm407_vm1, %v500_v7, %v501_v19  ;;  %v417_v37 = vrot.slane %v1352_v29, 1  ;;  %1129 = vmatprep.subr.msk.bf16.mxu0 %vm763_vm3, %v1203_v39  ;;  %1130 = vmatprep.subr.msk.bf16.mxu1 %vm763_vm3, %v1203_v39 }
  0x2e   : > { %v548_v27 = vrot.slane %v546_v21, 1  ;;  %v553_v35 = vrot.slane %v551_v28, 1  ;;  %v418_v41 = vrot.slane %v1359_v34, 1  ;;  %v346_v46 = vshll.u32 %v1418_v16, 16 }
  0x2f   : > { %v1440_v32 = vsel %vm294_vm2, %v478_v17, %v482_v25  ;;  %v765_v34 = vsel %vm763_vm3, %v1203_v39, 0  ;;  %v344_v48 = vshrl.u32 %v1418_v16, 16  ;;  %v351_v50 = vshll.u32 %v1190_v42, 16 }
  0x30   : > { %503 = vrot.lane.b32.xlu0 %v413_v23, %s1249_s8  ;;  %526 = vrot.lane.b32.xlu1 %v1352_v29, %s1250_s9  ;;  %v571_v23 = vrot.slane %v1392_v56, 1  ;;  %v549_v33 = vor.u32 %v548_v27, %v544_v15  ;;  %v348_v49 = vrot.slane %v346_v46, 1  ;;  %v420_v55 = vrot.slane %v1418_v16, 1 }
  0x31   : > { %1106 = vmatpush3.bf16.msra.mxu0 %v765_v34  ;;  %1128 = vmatpush3.bf16.msra.mxu1 %v765_v34  ;;  %v353_v52 = vrot.slane %v351_v50, 1  ;;  %v421_v57 = vrot.slane %v1190_v42, 1  ;;  %v358_v59 = vshll.u32 %v1468_v53, 16  ;;  %v363_v62 = vshll.u32 %v1192_v58, 16 }
  0x32   : > { %v1448_v38 = vsel %vm407_vm1, %v571_v23, %v572_v31  ;;  %v1457_v47 = vsel %vm294_vm2, %v549_v33, %v553_v35  ;;  %v349_v51 = vor.u32 %v348_v49, %v344_v48  ;;  %v423_v6 = vrot.slane %v1468_v53, 1 }
  0x33   : > { %v422_v60 = vsel %vm407_vm1, %v420_v55, %v421_v57  ;;  %v360_v61 = vrot.slane %v358_v59, 1  ;;  %v365_v4 = vrot.slane %v363_v62, 1  ;;  %v424_v7 = vrot.slane %v1192_v58, 1 }
  0x34   : > { %524 = vrot.lane.b32.xlu0 %v1325_v1, %s1250_s9  ;;  %557 = vrot.lane.b32.xlu1 %v1407_v8, %s1251_s10  ;;  %v354_v54 = vsel %vm294_vm2, %v349_v51, %v353_v52  ;;  %vm903_vm13 = vcmask 57344  }
  0x38   : > { %555 = vrot.lane.b32.xlu0 %v1363_v36, %s1251_s10  ;;  %395 = vrot.lane.b32.xlu1 %v1363_v36, %s1247_s6  ;;  %v419_v36 = vsel %vm407_vm1, %v417_v37, %v418_v41 }
  0x3c   : > { %574 = vrot.lane.b32.xlu0 %v1371_v40, %s1252_s23  ;;  %397 = vrot.lane.b32.xlu1 %v1407_v8, %s1247_s6 }
  0x40   : > { %576 = vrot.lane.b32.xlu0 %v419_v36, %s1252_s23  ;;  %438 = vrot.lane.b32.xlu1 %v419_v36, %s1246_s5 }
  0x44   : > { %436 = vrot.lane.b32.xlu0 %v1371_v40, %s1246_s5  ;;  %459 = vrot.lane.b32.xlu1 %v1418_v16, %s1245_s4  ;;  %v356_v40 = vshrl.u32 %v1468_v53, 16 }
  0x46   : > { %v361_v0 = vor.u32 %v360_v61, %v356_v40 }
  0x48   : > { %457 = vrot.lane.b32.xlu0 %v1352_v29, %s1245_s4  ;;  %490 = vrot.lane.b32.xlu1 %v354_v54, %s1248_s7  ;;  %v366_v5 = vsel %vm294_vm2, %v361_v0, %v365_v4 }
  0x4c   : > { %488 = vrot.lane.b32.xlu0 %v1407_v8, %s1248_s7  ;;  %509 = vrot.lane.b32.xlu1 %v422_v60, %s1249_s8  ;;  %v425_v8 = vsel %vm407_vm1, %v423_v6, %v424_v7 }
  0x50   : > { %507 = vrot.lane.b32.xlu0 %v419_v36, %s1249_s8  ;;  %530 = vrot.lane.b32.xlu1 %v1468_v53, %s1250_s9 }
  0x54   : > { %528 = vrot.lane.b32.xlu0 %v1418_v16, %s1250_s9  ;;  %561 = vrot.lane.b32.xlu1 %v366_v5, %s1251_s10 }
  0x58   : > { %559 = vrot.lane.b32.xlu0 %v354_v54, %s1251_s10  ;;  %399 = vrot.lane.b32.xlu1 %v354_v54, %s1247_s6 }
  0x5c   : > { %578 = vrot.lane.b32.xlu0 %v422_v60, %s1252_s23  ;;  %401 = vrot.lane.b32.xlu1 %v366_v5, %s1247_s6 }
  0x60   : > { %580 = vrot.lane.b32.xlu0 %v425_v8, %s1252_s23  ;;  %442 = vrot.lane.b32.xlu1 %v425_v8, %s1246_s5 }
  0x64   : > { %440 = vrot.lane.b32.xlu0 %v422_v60, %s1246_s5  ;;  %463 = vrot.lane.b32.xlu1 %v1375_v43, %s1245_s4 }
  0x68   : > { %461 = vrot.lane.b32.xlu0 %v1468_v53, %s1245_s4  ;;  %494 = vrot.lane.b32.xlu1 %v1410_v9, %s1248_s7 }
  0x6c   : > { %492 = vrot.lane.b32.xlu0 %v366_v5, %s1248_s7  ;;  %513 = vrot.lane.b32.xlu1 %v1399_v63, %s1249_s8 }
  0x70   : > { %511 = vrot.lane.b32.xlu0 %v425_v8, %s1249_s8  ;;  %534 = vrot.lane.b32.xlu1 %v1378_v44, %s1250_s9 }
  0x74   : > { %532 = vrot.lane.b32.xlu0 %v1375_v43, %s1250_s9  ;;  %565 = vrot.lane.b32.xlu1 %v1427_v22, %s1251_s10 }
  0x78   : > { %563 = vrot.lane.b32.xlu0 %v1410_v9, %s1251_s10  ;;  %403 = vrot.lane.b32.xlu1 %v1410_v9, %s1247_s6 }
  0x7c   : > { %582 = vrot.lane.b32.xlu0 %v1399_v63, %s1252_s23  ;;  %405 = vrot.lane.b32.xlu1 %v1427_v22, %s1247_s6 }
  0x80   : > { %584 = vrot.lane.b32.xlu0 %v1414_v14, %s1252_s23  ;;  %446 = vrot.lane.b32.xlu1 %v1414_v14, %s1246_s5 }
  0x84   : > { %444 = vrot.lane.b32.xlu0 %v1399_v63, %s1246_s5  ;;  %467 = vrot.lane.b32.xlu1 %v1381_v45, %s1245_s4 }
  0x88   : > { %465 = vrot.lane.b32.xlu0 %v1378_v44, %s1245_s4  ;;  %498 = vrot.lane.b32.xlu1 %v1440_v32, %s1248_s7 }
  0x8c   : > { %496 = vrot.lane.b32.xlu0 %v1427_v22, %s1248_s7  ;;  %517 = vrot.lane.b32.xlu1 %v1434_v26, %s1249_s8 }
  0x8d   : > { %v456_v9 = vpop.permute.xlu1 %455  ;;  %v454_v63 = vpop.permute.xlu0 %453 }
  0x90   : > { %515 = vrot.lane.b32.xlu0 %v1414_v14, %s1249_s8  ;;  %538 = vrot.lane.b32.xlu1 %v1392_v56, %s1250_s9 }
  0x92   : > { %v433_v10 = vpop.permute.xlu1 %432 }
  0x94   : > { %536 = vrot.lane.b32.xlu0 %v1381_v45, %s1250_s9  ;;  %569 = vrot.lane.b32.xlu1 %v1457_v47, %s1251_s10 }
  0x96   : > { %v392_v11 = vpop.permute.xlu0 %391  ;;  %v435_v12 = vpop.permute.xlu1 %434 }
  0x97   : > { %v592_v18 = vsel %vm590_vm4, %v1335_v3, %v392_v11 }
  0x98   : > { %567 = vrot.lane.b32.xlu0 %v1440_v32, %s1251_s10  ;;  %588 = vrot.lane.b32.xlu1 %v1448_v38, %s1252_s23  ;;  %v609_v22 = vsel %vm607_vm5, %v592_v18, %v433_v10 }
  0x99   : > { %v626_v25 = vsel %vm624_vm6, %v609_v22, %v454_v63 }
  0x9a   : > { %v394_v13 = vpop.permute.xlu0 %393  ;;  %v487_v14 = vpop.permute.xlu1 %486 }
  0x9b   : > { %v594_v19 = vsel %vm590_vm4, %v1328_v2, %v394_v13 }
  0x9c   : > { %586 = vrot.lane.b32.xlu0 %v1434_v26, %s1252_s23  ;;  %v611_v23 = vsel %vm607_vm5, %v594_v19, %v435_v12 }
  0x9d   : > { %v628_v24 = vsel %vm624_vm6, %v611_v23, %v456_v9 }
  0x9e   : > { %v485_v56 = vpop.permute.xlu0 %484  ;;  %v506_v15 = vpop.permute.xlu1 %505  ;;  %v645_v2 = vsel %vm641_vm7, %v628_v24, %v487_v14 }
  0x9f   : > { %v643_v28 = vsel %vm641_vm7, %v626_v25, %v485_v56  ;;  %v662_v37 = vsel %vm658_vm8, %v645_v2, %v506_v15 }
  0xa2   : > { %v504_v45 = vpop.permute.xlu0 %503  ;;  %v527_v17 = vpop.permute.xlu1 %526 }
  0xa3   : > { %v660_v3 = vsel %vm658_vm8, %v643_v28, %v504_v45  ;;  %v679_v38 = vsel %vm675_vm9, %v662_v37, %v527_v17 }
  0xa6   : > { %v525_v20 = vpop.permute.xlu0 %524  ;;  %v558_v21 = vpop.permute.xlu1 %557 }
  0xa7   : > { %v677_v30 = vsel %vm675_vm9, %v660_v3, %v525_v20  ;;  %v696_v39 = vsel %vm692_vm11, %v679_v38, %v558_v21 }
  0xaa   : > { %v556_v26 = vpop.permute.xlu0 %555  ;;  %v396_v27 = vpop.permute.xlu1 %395 }
  0xab   : > { %v694_v31 = vsel %vm692_vm11, %v677_v30, %v556_v26  ;;  %v596_v57 = vsel %vm590_vm4, %v1325_v1, %v396_v27 }
  0xae   : > { %v575_v32 = vpop.permute.xlu0 %574  ;;  %v398_v33 = vpop.permute.xlu1 %397 }
  0xaf   : > { %v711_v35 = vsel %vm709_vm10, %v694_v31, %v575_v32  ;;  %v598_v59 = vsel %vm590_vm4, %v1352_v29, %v398_v33 }
  0xb0   : > { %1107 = vmatprep.mubr.msk.bf16.mxu0 %vm746_vm12, %v711_v35 }
  0xb2   : > { %v577_v41 = vpop.permute.xlu0 %576  ;;  %v439_v42 = vpop.permute.xlu1 %438 }
  0xb3   : > { %v713_v46 = vsel %vm709_vm10, %v696_v39, %v577_v41  ;;  %v615_v4 = vsel %vm607_vm5, %v598_v59, %v439_v42 }
  0xb4   : > { %1108 = vmatmul.mubr.msk.bf16.vlgmr.msra.gmra.mrb[0].mxu0 %vm746_vm12, %v713_v46 }
  0xb6   : > { %v437_v47 = vpop.permute.xlu0 %436  ;;  %v460_v34 = vpop.permute.xlu1 %459 }
  0xb7   : > { %v613_v58 = vsel %vm607_vm5, %v596_v57, %v437_v47  ;;  %v632_v6 = vsel %vm624_vm6, %v615_v4, %v460_v34 }
  0xba   : > { %v458_v36 = vpop.permute.xlu0 %457  ;;  %v491_v48 = vpop.permute.xlu1 %490 }
  0xbb   : > { %v630_v60 = vsel %vm624_vm6, %v613_v58, %v458_v36  ;;  %v649_v29 = vsel %vm641_vm7, %v632_v6, %v491_v48 }
  0xbe   : > { %v489_v49 = vpop.permute.xlu0 %488  ;;  %v510_v50 = vpop.permute.xlu1 %509 }
  0xbf   : > { %v647_v62 = vsel %vm641_vm7, %v630_v60, %v489_v49  ;;  %v666_v63 = vsel %vm658_vm8, %v649_v29, %v510_v50 }
  0xc2   : > { %v508_v51 = vpop.permute.xlu0 %507  ;;  %v531_v52 = vpop.permute.xlu1 %530 }
  0xc3   : > { %v664_v0 = vsel %vm658_vm8, %v647_v62, %v508_v51  ;;  %v683_v10 = vsel %vm675_vm9, %v666_v63, %v531_v52 }
  0xc6   : > { %v529_v54 = vpop.permute.xlu0 %528  ;;  %v562_v55 = vpop.permute.xlu1 %561 }
  0xc7   : > { %v681_v5 = vsel %vm675_vm9, %v664_v0, %v529_v54  ;;  %v700_v11 = vsel %vm692_vm11, %v683_v10, %v562_v55 }
  0xca   : > { %v560_v40 = vpop.permute.xlu0 %559  ;;  %v400_v61 = vpop.permute.xlu1 %399 }
  0xcb   : > { %v698_v1 = vsel %vm692_vm11, %v681_v5, %v560_v40  ;;  %v600_v24 = vsel %vm590_vm4, %v1418_v16, %v400_v61 }
  0xce   : > { %v579_v7 = vpop.permute.xlu0 %578  ;;  %v402_v8 = vpop.permute.xlu1 %401 }
  0xcf   : > { %v715_v9 = vsel %vm709_vm10, %v698_v1, %v579_v7  ;;  %v602_v26 = vsel %vm590_vm4, %v1468_v53, %v402_v8 }
  0xd0   : > { %1111 = vmatprep.mubr.msk.bf16.mxu0 %vm746_vm12, %v715_v9 }
  0xd2   : > { %v581_v12 = vpop.permute.xlu0 %580  ;;  %v443_v13 = vpop.permute.xlu1 %442 }
  0xd3   : > { %v717_v14 = vsel %vm709_vm10, %v700_v11, %v581_v12  ;;  %v619_v31 = vsel %vm607_vm5, %v602_v26, %v443_v13 }
  0xd4   : > { %1112 = vmatmul.mubr.msk.bf16.gmra.mrb[4].mxu0 %vm746_vm12, %v717_v14 }
  0xd6   : > { %v441_v56 = vpop.permute.xlu0 %440  ;;  %v464_v15 = vpop.permute.xlu1 %463 }
  0xd7   : > { %v617_v25 = vsel %vm607_vm5, %v600_v24, %v441_v56  ;;  %v636_v33 = vsel %vm624_vm6, %v619_v31, %v464_v15 }
  0xda   : > { %v462_v45 = vpop.permute.xlu0 %461  ;;  %v495_v17 = vpop.permute.xlu1 %494 }
  0xdb   : > { %v634_v27 = vsel %vm624_vm6, %v617_v25, %v462_v45  ;;  %v653_v53 = vsel %vm641_vm7, %v636_v33, %v495_v17 }
  0xde   : > { %v493_v18 = vpop.permute.xlu0 %492  ;;  %v514_v19 = vpop.permute.xlu1 %513 }
  0xdf   : > { %v651_v2 = vsel %vm641_vm7, %v634_v27, %v493_v18  ;;  %v670_v39 = vsel %vm658_vm8, %v653_v53, %v514_v19 }
  0xe2   : > { %v512_v20 = vpop.permute.xlu0 %511  ;;  %v535_v21 = vpop.permute.xlu1 %534 }
  0xe3   : > { %v668_v30 = vsel %vm658_vm8, %v651_v2, %v512_v20  ;;  %v687_v41 = vsel %vm675_vm9, %v670_v39, %v535_v21 }
  0xe6   : > { %v533_v22 = vpop.permute.xlu0 %532  ;;  %v566_v23 = vpop.permute.xlu1 %565 }
  0xe7   : > { %v685_v32 = vsel %vm675_vm9, %v668_v30, %v533_v22  ;;  %v704_v42 = vsel %vm692_vm11, %v687_v41, %v566_v23 }
  0xea   : > { %v564_v28 = vpop.permute.xlu0 %563  ;;  %v404_v3 = vpop.permute.xlu1 %403 }
  0xeb   : > { %v702_v16 = vsel %vm692_vm11, %v685_v32, %v564_v28  ;;  %v604_v60 = vsel %vm590_vm4, %v1375_v43, %v404_v3 }
  0xee   : > { %v583_v35 = vpop.permute.xlu0 %582  ;;  %v406_v37 = vpop.permute.xlu1 %405 }
  0xef   : > { %v719_v38 = vsel %vm709_vm10, %v702_v16, %v583_v35  ;;  %v606_v58 = vsel %vm590_vm4, %v1378_v44, %v406_v37 }
  0xf0   : > { %1115 = vmatprep.mubr.msk.bf16.mxu1 %vm746_vm12, %v719_v38 }
  0xf2   : > { %v585_v46 = vpop.permute.xlu0 %584  ;;  %v447_v47 = vpop.permute.xlu1 %446 }
  0xf3   : > { %v721_v34 = vsel %vm709_vm10, %v704_v42, %v585_v46  ;;  %v623_v61 = vsel %vm607_vm5, %v606_v58, %v447_v47 }
  0xf4   : > { %1116 = vmatmul.mubr.msk.bf16.vlgmr.msra.gmra.mrb[0].mxu1 %vm746_vm12, %v721_v34 }
  0xf6   : > { %v445_v36 = vpop.permute.xlu0 %444  ;;  %v468_v48 = vpop.permute.xlu1 %467 }
  0xf7   : > { %v621_v40 = vsel %vm607_vm5, %v604_v60, %v445_v36  ;;  %v640_v4 = vsel %vm624_vm6, %v623_v61, %v468_v48 }
  0xfa   : > { %v466_v49 = vpop.permute.xlu0 %465  ;;  %v499_v50 = vpop.permute.xlu1 %498 }
  0xfb   : > { %v638_v62 = vsel %vm624_vm6, %v621_v40, %v466_v49  ;;  %v657_v6 = vsel %vm641_vm7, %v640_v4, %v499_v50 }
  0xfe   : > { %v497_v51 = vpop.permute.xlu0 %496  ;;  %v518_v52 = vpop.permute.xlu1 %517 }
  0xff   : > { %v655_v5 = vsel %vm641_vm7, %v638_v62, %v497_v51  ;;  %v674_v44 = vsel %vm658_vm8, %v657_v6, %v518_v52 }
 0x102   : > { %v516_v54 = vpop.permute.xlu0 %515  ;;  %v539_v55 = vpop.permute.xlu1 %538 }
 0x103   : > { %v672_v1 = vsel %vm658_vm8, %v655_v5, %v516_v54  ;;  %v691_v8 = vsel %vm675_vm9, %v674_v44, %v539_v55 }
 0x106   : > { %v537_v57 = vpop.permute.xlu0 %536  ;;  %v570_v59 = vpop.permute.xlu1 %569 }
 0x107   : > { %v689_v7 = vsel %vm675_vm9, %v672_v1, %v537_v57  ;;  %v708_v63 = vsel %vm692_vm11, %v691_v8, %v570_v59 }
 0x10a   : > { %v568_v0 = vpop.permute.xlu0 %567  ;;  %v589_v43 = vpop.permute.xlu1 %588 }
 0x10b   : > { %v706_v29 = vsel %vm692_vm11, %v689_v7, %v568_v0  ;;  %v725_v11 = vsel %vm709_vm10, %v708_v63, %v589_v43 }
 0x10e   : > { %v587_v9 = vpop.permute.xlu0 %586 }
 0x10f   : > { %v723_v10 = vsel %vm709_vm10, %v706_v29, %v587_v9 }
 0x110   : > { %1119 = vmatprep.mubr.msk.bf16.mxu1 %vm746_vm12, %v723_v10 }
 0x111   : > { %1120 = vmatmul.mubr.msk.bf16.gmra.mrb[4].mxu1 %vm746_vm12, %v725_v11 }
 0x187   : > { %v1109_v12 = vpop.f32.mrb[0].mxu0 }
 0x188   : > { %v801_v13 = vpop.f32.mrb[1].mxu0  ;;  %v908_v45 = vmul.f32 %v1109_v12, %v1109_v12  ;;  %v868_v21 = vsel %vm607_vm5, %v1109_v12, 0.0 }
 0x189   : > { %v906_v14 = vmul.f32 %v801_v13, %v801_v13  ;;  %v1110_v56 = vpop.f32.mrb[2].mxu0  ;;  %v865_v17 = vsel %vm607_vm5, %v801_v13, 0.0 }
 0x18a   : > { %v804_v15 = vpop.f32.mrb[3].mxu0  ;;  %v909_v23 = vmul.f32 %v1110_v56, %v1110_v56  ;;  %v925_v27 = vsel %vm607_vm5, %v908_v45, 0.0  ;;  %v870_v28 = vsel %vm607_vm5, %v1110_v56, 0.0 }
 0x18b   : > { %v866_v18 = vsel %vm607_vm5, %v804_v15, 0.0  ;;  %v907_v19 = vmul.f32 %v804_v15, %v804_v15  ;;  %v922_v22 = vsel %vm607_vm5, %v906_v14, 0.0 }
 0x18c   : > { %v867_v20 = vadd.f32 %v866_v18, %v865_v17  ;;  %v927_v30 = vsel %vm607_vm5, %v909_v23, 0.0 }
 0x18d   : > { %v923_v24 = vsel %vm607_vm5, %v907_v19, 0.0 }
 0x18e   : > { %v869_v25 = vadd.f32 %v868_v21, %v867_v20  ;;  %v924_v26 = vadd.f32 %v923_v24, %v922_v22 }
 0x190   : > { %v926_v3 = vadd.f32 %v925_v27, %v924_v26  ;;  %v871_v2 = vadd.f32 %v870_v28, %v869_v25 }
 0x192   : > { %v928_v31 = vadd.f32 %v927_v30, %v926_v3 }
 0x1a7   : > { %v1113_v32 = vpop.f32.mrb[4].mxu0 }
 0x1a8   : > { %v817_v33 = vpop.f32.mrb[5].mxu0  ;;  %v912_v39 = vmul.f32 %v1113_v32, %v1113_v32  ;;  %v876_v36 = vsel %vm607_vm5, %v1113_v32, 0.0 }
 0x1a9   : > { %v872_v16 = vsel %vm607_vm5, %v817_v33, 0.0  ;;  %v910_v35 = vmul.f32 %v817_v33, %v817_v33  ;;  %v1114_v37 = vpop.f32.mrb[6].mxu0 }
 0x1aa   : > { %v873_v53 = vadd.f32 %v872_v16, %v871_v2  ;;  %v820_v38 = vpop.f32.mrb[7].mxu0  ;;  %v913_v48 = vmul.f32 %v1114_v37, %v1114_v37  ;;  %v933_v52 = vsel %vm607_vm5, %v912_v39, 0.0  ;;  %v878_v54 = vsel %vm607_vm5, %v1114_v37, 0.0 }
 0x1ab   : > { %v929_v41 = vsel %vm607_vm5, %v910_v35, 0.0  ;;  %v874_v42 = vsel %vm607_vm5, %v820_v38, 0.0  ;;  %v911_v46 = vmul.f32 %v820_v38, %v820_v38 }
 0x1ac   : > { %v930_v47 = vadd.f32 %v929_v41, %v928_v31  ;;  %v875_v34 = vadd.f32 %v874_v42, %v873_v53  ;;  %v935_v58 = vsel %vm607_vm5, %v913_v48, 0.0 }
 0x1ad   : > { %v931_v49 = vsel %vm607_vm5, %v911_v46, 0.0 }
 0x1ae   : > { %v877_v50 = vadd.f32 %v876_v36, %v875_v34  ;;  %v932_v51 = vadd.f32 %v931_v49, %v930_v47 }
 0x1b0   : > { %v934_v55 = vadd.f32 %v933_v52, %v932_v51  ;;  %v879_v57 = vadd.f32 %v878_v54, %v877_v50  ;;  %v864_v51 = vld [vmem:[%s1308_s22] sm:$0x1] }
 0x1b2   : > { %v936_v59 = vadd.f32 %v935_v58, %v934_v55  ;;  %v905_v55 = vld [vmem:[%s1313_s25] sm:$0x1] }
 0x1c7   : > { %v1117_v60 = vpop.f32.mrb[0].mxu1 }
 0x1c8   : > { %v833_v40 = vpop.f32.mrb[1].mxu1  ;;  %v916_v6 = vmul.f32 %v1117_v60, %v1117_v60  ;;  %v884_v29 = vsel %vm607_vm5, %v1117_v60, 0.0 }
 0x1c9   : > { %v880_v61 = vsel %vm607_vm5, %v833_v40, 0.0  ;;  %v914_v62 = vmul.f32 %v833_v40, %v833_v40  ;;  %v1118_v0 = vpop.f32.mrb[2].mxu1 }
 0x1ca   : > { %v881_v4 = vadd.f32 %v880_v61, %v879_v57  ;;  %v836_v5 = vpop.f32.mrb[3].mxu1  ;;  %v917_v9 = vmul.f32 %v1118_v0, %v1118_v0  ;;  %v941_v12 = vsel %vm607_vm5, %v916_v6, 0.0  ;;  %v886_v13 = vsel %vm607_vm5, %v1118_v0, 0.0 }
 0x1cb   : > { %v937_v1 = vsel %vm607_vm5, %v914_v62, 0.0  ;;  %v882_v44 = vsel %vm607_vm5, %v836_v5, 0.0  ;;  %v915_v7 = vmul.f32 %v836_v5, %v836_v5 }
 0x1cc   : > { %v938_v43 = vadd.f32 %v937_v1, %v936_v59  ;;  %v883_v8 = vadd.f32 %v882_v44, %v881_v4  ;;  %v943_v15 = vsel %vm607_vm5, %v917_v9, 0.0 }
 0x1cd   : > { %v939_v63 = vsel %vm607_vm5, %v915_v7, 0.0 }
 0x1ce   : > { %v885_v10 = vadd.f32 %v884_v29, %v883_v8  ;;  %v940_v11 = vadd.f32 %v939_v63, %v938_v43 }
 0x1d0   : > { %v942_v14 = vadd.f32 %v941_v12, %v940_v11  ;;  %v887_v56 = vadd.f32 %v886_v13, %v885_v10 }
 0x1d2   : > { %v944_v45 = vadd.f32 %v943_v15, %v942_v14 }
 0x1e4   : > { %v1121_v17 = vpop.f32.mrb[4].mxu1 }
 0x1e5   : > { %v849_v18 = vpop.f32.mrb[5].mxu1  ;;  %v920_v24 = vmul.f32 %v1121_v17, %v1121_v17  ;;  %v892_v2 = vsel %vm607_vm5, %v1121_v17, 0.0 }
 0x1e6   : > { %v888_v19 = vsel %vm607_vm5, %v849_v18, 0.0  ;;  %v918_v20 = vmul.f32 %v849_v18, %v849_v18  ;;  %v1122_v21 = vpop.f32.mrb[6].mxu1 }
 0x1e7   : > { %v889_v22 = vadd.f32 %v888_v19, %v887_v56  ;;  %v852_v23 = vpop.f32.mrb[7].mxu1  ;;  %v921_v30 = vmul.f32 %v1122_v21, %v1122_v21  ;;  %v949_v16 = vsel %vm607_vm5, %v920_v24, 0.0  ;;  %v894_v35 = vsel %vm607_vm5, %v1122_v21, 0.0 }
 0x1e8   : > { %v945_v25 = vsel %vm607_vm5, %v918_v20, 0.0  ;;  %v890_v26 = vsel %vm607_vm5, %v852_v23, 0.0  ;;  %v919_v27 = vmul.f32 %v852_v23, %v852_v23 }
 0x1e9   : > { %v946_v28 = vadd.f32 %v945_v25, %v944_v45  ;;  %v891_v3 = vadd.f32 %v890_v26, %v889_v22  ;;  %v951_v38 = vsel %vm607_vm5, %v921_v30, 0.0 }
 0x1ea   : > { %v947_v31 = vsel %vm607_vm5, %v919_v27, 0.0 }
 0x1eb   : > { %v893_v32 = vadd.f32 %v892_v2, %v891_v3  ;;  %v948_v33 = vadd.f32 %v947_v31, %v946_v28 }
 0x1ed   : > { %v895_v37 = vadd.f32 %v894_v35, %v893_v32  ;;  %v950_v53 = vadd.f32 %v949_v16, %v948_v33 }
 0x1ef   : > { %v896_v39 = vrot.slane %v895_v37, 4  ;;  %v952_v41 = vadd.f32 %v951_v38, %v950_v53 }
 0x1f1   : > { %v897_v42 = vadd.f32 %v896_v39, %v895_v37  ;;  %v953_v46 = vrot.slane %v952_v41, 4 }
 0x1f3   : > { %v898_v47 = vrot.slane %v897_v42, 2  ;;  %v954_v34 = vadd.f32 %v953_v46, %v952_v41 }
 0x1f5   : > { %v899_v36 = vadd.f32 %v898_v47, %v897_v42  ;;  %v955_v48 = vrot.slane %v954_v34, 2 }
 0x1f7   : > { %v900_v49 = vrot.slane %v899_v36, 1  ;;  %v956_v50 = vadd.f32 %v955_v48, %v954_v34 }
 0x1f9   : > { %v901_v52 = vadd.f32 %v900_v49, %v899_v36  ;;  %v957_v54 = vrot.slane %v956_v50, 1 }
 0x1fb   : > { %v902_v57 = vadd.f32 %v901_v52, %v864_v51  ;;  %v958_v58 = vadd.f32 %v957_v54, %v956_v50 }
 0x1fd   : > { %904 = vst.msk [vmem:[%s1308_s22] sm:$0x1] %vm903_vm13, %v902_v57  ;;  %v959_v59 = vadd.f32 %v958_v58, %v905_v55 }
 0x1ff   : > { %960 = vst.msk [vmem:[%s1313_s25] sm:$0x1] %vm903_vm13, %v959_v59 }
 0x200 PF: > { %s14_s16 = sadd.s32 1, %s1242_s16   ;;  %s1691_s12 = smov %s1234_s14 }
 0x201   : > { %p11_p7 = scmp.ge.s32.totalorder %s14_s16, 6   ;;  %s1692_s13 = smov %s1238_s15 }
 0x202   : > { %s1693_s14 = smov %s1696_s17  ;;  %s1694_s15 = smov %s1700_s18 }
 0x203   :  { %13 = sbr.rel (!%p11_p7) target bundleno = 3 (0x3), region = 75 }

// kernel: conv_block_forward.3
= control target key start
LH: loop header
LB: loop body
LE: loop exit
PB: predicated region body
PF: predicated region fallthrough
CT: control target
= control target key end

     0   :  { %s1288_s15 = smov 0   ;;  %s1290_s16 = smov 0   ;;  %s1737_s0 = inlined_call_operand.vmem [shape: bf16[2,18,18,4], index: 0, kind: input, shape index: {}]   ;;  %s1738_s1 = inlined_call_operand.vmem [shape: bf16[36,8], index: 1, kind: input, shape index: {}]   ;;  %s1739_s2 = inlined_call_operand.vmem [shape: f32[1,8], index: 2, kind: input, shape index: {}]   ;;  %s1740_s3 = inlined_call_operand.vmem [shape: f32[1,8], index: 3, kind: input, shape index: {}]   ;;  %s1741_s4 = inlined_call_operand.vmem [shape: f32[2,256,8], index: 4, kind: output, shape index: {}]  }
   0x1   :  { %s1292_s17 = smov 0   ;;  %s1294_s18 = smov 0  }
   0x2   :  { %s1296_s19 = smov 0  }
   0x3 LB: > { %s23_s20 = sadd.s32 1, %s1245_s17  ;;  %s26_s21 = sadd.s32 1, %s1249_s18  ;;  %s1253_s19 = sphi %s1296_s19, %s14_s19   ;;  %s1249_s18 = sphi %s1294_s18, %s1745_s18   ;;  %s1245_s17 = sphi %s1292_s17, %s1744_s17   ;;  %s1241_s16 = sphi %s1290_s16, %s1743_s16   ;;  %s1237_s15 = sphi %s1288_s15, %s1742_s15  }
   0x4   : > { %p24_p0 = scmp.ge.s32.totalorder %s23_s20, 2  ;;  %p1058_p1 = scmp.ge.s32.totalorder %s1253_s19, 1 }
   0x5   : > { %p176_p2 = scmp.lt.s32.totalorder %s1253_s19, 5 }
   0x6   : > { %s1747_s20 = smov (%p24_p0, %s23_s20), 0  ;;  %s1749_s21 = smov (!%p24_p0, %s26_s21), %s1249_s18 }
   0x7   : > { %p177_p3 = pnand %p1058_p1, %p176_p2  ;;  %p28_p4 = scmp.ge.s32.totalorder %s1749_s21, 2 }
   0x8   : > { %p206_p5 = scmp.lt.s32.totalorder (!%p177_p3), %s1241_s16, 1  ;;  %s1101_s22 = smul.u32 (!%p177_p3), 96, %s1237_s15  ;;  %vm433_vm0 = vcmask (!%p177_p3), 1046528   ;;  %vm320_vm1 = vsmask.f32 (!%p177_p3), 7424  ;;  %vm789_vm2 = vcmask (!%p177_p3), 1041408  }
   0x9   : > { %s1751_s21 = smov (%p28_p4, %s1749_s21), 0  ;;  %180 = sbr.rel (%p177_p3) target bundleno = 485 (0x1e5), region = 36 }
   0xa   : > { %s1255_s28 = smov (!%p177_p3), 12   ;;  %s1256_s29 = smov (!%p177_p3), 8   ;;  %vm616_vm3 = vcmask (!%p177_p3), 31744   ;;  %vm633_vm4 = vcmask (!%p177_p3), 64512   ;;  %vm667_vm5 = vcmask (!%p177_p3), 130048   ;;  %vm650_vm6 = vcmask (!%p177_p3), 97280  }
   0xb   : > { %s1257_s30 = smov (!%p177_p3), 4   ;;  %s1258_s5 = smov (!%p177_p3), 16   ;;  %vm684_vm7 = vcmask (!%p177_p3), 162816   ;;  %vm701_vm8 = vcmask (!%p177_p3), 195584   ;;  %vm718_vm9 = vcmask (!%p177_p3), 228352   ;;  %vm735_vm10 = vcmask (!%p177_p3), 261120  }
   0xc   : > { %s1259_s6 = smov (!%p177_p3), 20   ;;  %s1260_s7 = smov (!%p177_p3), 24   ;;  %vm772_vm11 = vcmask (!%p177_p3), 293888  }
   0xd   : > { %s1261_s12 = smov (!%p177_p3), 28  }
  0x10   : > { %s1753_s16 = smov (!%p206_p5, %s1241_s16), 1 }
  0x11   : > { %s1143_s23 = smul.u32 216, %s1753_s16  ;;  %s1061_s24 = sshll.u32 %s1753_s16, 5 }
  0x13   : > { %s210_s26 = scalar_lea.vmem %s1737_s0, %s1143_s23  ;;  %s1060_s23 = sshll.u32 %s1237_s15, 4 }
  0x14   : > { %s1327_s27 = scalar_lea.vmem %s210_s26, %s1101_s22  ;;  %s1262_s22 = smov 32  }
  0x15   : > { %v1330_v0 = vld [vmem:[%s1327_s27 + $0x3c] sm:$0xff]   ;;  %v1333_v1 = vld [vmem:[%s1327_s27 + $0xc] sm:$0xff]   ;;  %v1195_v3 = vld [vmem:[%s1327_s27 + $0x38] ss:$0 sps:$4 sm:$0x11]   ;;  %p214_p6 = scmp.lt.s32.totalorder %s1060_s23, 31 }
  0x16   : > { %487 = vrot.lane.b32.xlu1 %v1330_v0, %s1255_s28  ;;  %479 = vrot.lane.b32.xlu0 %v1333_v1, %s1255_s28  ;;  %v1340_v2 = vld [vmem:[%s1327_s27 + $0x30] sm:$0xff]   ;;  %v1344_v4 = vld [vmem:[%s1327_s27] sm:$0xff]   ;;  %v449_v5 = vrot.slane %v1330_v0, 1  ;;  %v447_v7 = vrot.slane %v1195_v3, 1  ;;  %v437_v9 = vrot.slane %v1333_v1, 1  ;;  %v334_v16 = vshrl.u32 %v1333_v1, 16 }
  0x17   : > { %v446_v6 = vrot.slane %v1340_v2, 1  ;;  %v1197_v8 = vld [vmem:[%s1327_s27 + $0x8] ss:$0 sps:$4 sm:$0x11]   ;;  %v434_v10 = vrot.slane %v1344_v4, 1  ;;  %v336_v17 = vshll.u32 %v1333_v1, 16 }
  0x18   : > { %v1198_v11 = vld [vmem:[%s1327_s27 + $0x44] ss:$0 sps:$4 sm:$0x11]   ;;  %v435_v13 = vrot.slane %v1197_v8, 1  ;;  %v322_v18 = vshrl.u32 %v1344_v4, 16  ;;  %v324_v22 = vshll.u32 %v1344_v4, 16 }
  0x19   : > { %v1353_v12 = vsel %vm433_vm0, %v446_v6, %v447_v7  ;;  %v1199_v14 = vld [vmem:[%s1327_s27 + $0x14] ss:$0 sps:$4 sm:$0x11]   ;;  %v450_v15 = vrot.slane %v1198_v11, 1  ;;  %v338_v24 = vrot.slane %v336_v17, 1  ;;  %v329_v25 = vshll.u32 %v1197_v8, 16 }
  0x1a   : > { %466 = vrot.lane.b32.xlu1 %v1353_v12, %s1256_s29  ;;  %v436_v19 = vsel %vm433_vm0, %v434_v10, %v435_v13  ;;  %v438_v20 = vrot.slane %v1199_v14, 1  ;;  %v341_v21 = vshll.u32 %v1199_v14, 16  ;;  %v382_v26 = vshrl.u32 %v1330_v0, 16  ;;  %v1377_v39 = vld [vmem:[%s1327_s27 + $0x48] sm:$0xff]   ;;  %v1384_v46 = vld [vmem:[%s1327_s27 + $0x18] sm:$0xff]   ;;  %v1402_v57 = vld [vmem:[%s1327_s27 + $0x60] sm:$0xff]  }
  0x1b   : > { %458 = vrot.lane.b32.xlu0 %v436_v19, %s1256_s29  ;;  %v1365_v23 = vsel %vm433_vm0, %v449_v5, %v450_v15  ;;  %v326_v29 = vrot.slane %v324_v22, 1  ;;  %v384_v30 = vshll.u32 %v1330_v0, 16  ;;  %v339_v31 = vor.u32 %v338_v24, %v334_v16  ;;  %v1202_v47 = vld [vmem:[%s1327_s27 + $0x50] ss:$0 sps:$4 sm:$0x11]   ;;  %s1755_s23 = smov (!%p214_p6, %s1060_s23), 31 }
  0x1c   : > { %v1369_v27 = vsel %vm433_vm0, %v437_v9, %v438_v20  ;;  %v343_v28 = vrot.slane %v341_v21, 1  ;;  %v331_v32 = vrot.slane %v329_v25, 1  ;;  %v389_v33 = vshll.u32 %v1198_v11, 16  ;;  %v1203_v51 = vld [vmem:[%s1327_s27 + $0x20] ss:$0 sps:$4 sm:$0x11]   ;;  %s217_s25 = sadd.s32 %s1061_s24, %s1755_s23 }
  0x1d   : > { %v370_v34 = vshrl.u32 %v1340_v2, 16  ;;  %v327_v35 = vor.u32 %v326_v29, %v322_v18  ;;  %v386_v36 = vrot.slane %v384_v30, 1  ;;  %v372_v37 = vshll.u32 %v1340_v2, 16  ;;  %v1410_v61 = vld [vmem:[%s1327_s27 + $0x6c] sm:$0xff]  }
  0x1e   : > { %468 = vrot.lane.b32.xlu1 %v1365_v23, %s1256_s29  ;;  %v377_v38 = vshll.u32 %v1195_v3, 16  ;;  %v344_v40 = vsel %vm320_vm1, %v339_v31, %v343_v28  ;;  %v391_v41 = vrot.slane %v389_v33, 1  ;;  %v396_v50 = vshll.u32 %v1377_v39, 16  ;;  %v1209_v3 = vld [vmem:[%s1327_s27 + $0x68] ss:$0 sps:$4 sm:$0x11]  }
  0x1f   : > { %460 = vrot.lane.b32.xlu0 %v1369_v27, %s1256_s29  ;;  %v332_v42 = vsel %vm320_vm1, %v327_v35, %v331_v32  ;;  %v387_v43 = vor.u32 %v386_v36, %v382_v26  ;;  %v374_v44 = vrot.slane %v372_v37, 1  ;;  %v348_v53 = vshll.u32 %v1384_v46, 16  ;;  %v1211_v15 = vld [vmem:[%s1327_s27 + $0x74] ss:$0 sps:$4 sm:$0x11]  }
  0x20   : > { %v379_v45 = vrot.slane %v377_v38, 1  ;;  %v394_v54 = vshrl.u32 %v1377_v39, 16  ;;  %v398_v55 = vrot.slane %v396_v50, 1  ;;  %v401_v56 = vshll.u32 %v1202_v47, 16  ;;  %v1455_v38 = vld [vmem:[%s1327_s27 + $0x54] sm:$0xff]  }
  0x21   : > { %v1389_v48 = vsel %vm320_vm1, %v387_v43, %v391_v41  ;;  %v375_v49 = vor.u32 %v374_v44, %v370_v34  ;;  %v353_v58 = vshll.u32 %v1203_v51, 16  ;;  %v346_v59 = vshrl.u32 %v1384_v46, 16  ;;  %v1461_v41 = vld [vmem:[%s1327_s27 + $0x24] sm:$0xff]   ;;  %v1207_v44 = vld [vmem:[%s1327_s27 + $0x2c] ss:$0 sps:$4 sm:$0x11]  }
  0x22   : > { %419 = vrot.lane.b32.xlu1 %v344_v40, %s1257_s30  ;;  %v350_v60 = vrot.slane %v348_v53, 1  ;;  %v399_v62 = vor.u32 %v398_v55, %v394_v54  ;;  %v403_v63 = vrot.slane %v401_v56, 1  ;;  %v499_v5 = vshrl.u32 %v1402_v57, 16  ;;  %v1213_v55 = vld [vmem:[%s1738_s1 + $0x8] sm:$0xff]  }
  0x23   : > { %417 = vrot.lane.b32.xlu0 %v332_v42, %s1257_s30  ;;  %v1395_v52 = vsel %vm320_vm1, %v375_v49, %v379_v45  ;;  %v501_v6 = vshll.u32 %v1402_v57, 16  ;;  %v355_v7 = vrot.slane %v353_v58, 1  ;;  %v526_v8 = vrot.slane %v1402_v57, 1  ;;  %v1206_v42 = vld [vmem:[%s1327_s27 + $0x5c] ss:$0 sps:$4 sm:$0x11]  }
  0x24   : > { %v351_v9 = vor.u32 %v350_v60, %v346_v59  ;;  %v506_v11 = vshll.u32 %v1209_v3, 16  ;;  %v570_v13 = vshrl.u32 %v1410_v61, 16  ;;  %v527_v14 = vrot.slane %v1209_v3, 1 }
  0x25   : > { %v503_v10 = vrot.slane %v501_v6, 1  ;;  %v572_v16 = vshll.u32 %v1410_v61, 16  ;;  %v597_v17 = vrot.slane %v1410_v61, 1  ;;  %v1425_v18 = vsel %vm320_vm1, %v399_v62, %v403_v63  ;;  %v1214_v62 = vld [vmem:[%s1738_s1 + $0x10] ss:$0 sps:$4 sm:$0x33]  }
  0x26   : > { %427 = vrot.lane.b32.xlu1 %v1389_v48, %s1257_s30  ;;  %v508_v20 = vrot.slane %v506_v11, 1  ;;  %v1429_v21 = vsel %vm433_vm0, %v526_v8, %v527_v14  ;;  %v577_v24 = vshll.u32 %v1211_v15, 16  ;;  %v598_v25 = vrot.slane %v1211_v15, 1 }
  0x27   : > { %425 = vrot.lane.b32.xlu0 %v1395_v52, %s1257_s30  ;;  %v504_v19 = vor.u32 %v503_v10, %v499_v5  ;;  %v574_v22 = vrot.slane %v572_v16, 1  ;;  %v1432_v26 = vsel %vm320_vm1, %v351_v9, %v355_v7  ;;  %v452_v32 = vrot.slane %v1377_v39, 1 }
  0x28   : > { %v579_v30 = vrot.slane %v577_v24, 1  ;;  %v1440_v31 = vsel %vm433_vm0, %v597_v17, %v598_v25  ;;  %v453_v33 = vrot.slane %v1202_v47, 1  ;;  %v440_v35 = vrot.slane %v1384_v46, 1 }
  0x29   : > { %v1435_v28 = vsel %vm320_vm1, %v504_v19, %v508_v20  ;;  %v575_v29 = vor.u32 %v574_v22, %v570_v13  ;;  %v441_v36 = vrot.slane %v1203_v51, 1  ;;  %v408_v43 = vshll.u32 %v1455_v38, 16 }
  0x2a   : > { %489 = vrot.lane.b32.xlu1 %v1377_v39, %s1255_s28  ;;  %v1452_v37 = vsel %vm433_vm0, %v452_v32, %v453_v33  ;;  %v360_v45 = vshll.u32 %v1461_v41, 16  ;;  %v406_v47 = vshrl.u32 %v1455_v38, 16  ;;  %v413_v50 = vshll.u32 %v1206_v42, 16 }
  0x2b   : > { %481 = vrot.lane.b32.xlu0 %v1384_v46, %s1255_s28  ;;  %v1446_v34 = vsel %vm320_vm1, %v575_v29, %v579_v30  ;;  %v410_v49 = vrot.slane %v408_v43, 1  ;;  %v358_v51 = vshrl.u32 %v1461_v41, 16  ;;  %v365_v54 = vshll.u32 %v1207_v44, 16 }
  0x2c   : > { %v362_v53 = vrot.slane %v360_v45, 1  ;;  %v415_v58 = vrot.slane %v413_v50, 1  ;;  %v791_v3 = vsel %vm789_vm2, %v1214_v62, 0  ;;  %v455_v6 = vrot.slane %v1455_v38, 1 }
  0x2d   : > { %v411_v56 = vor.u32 %v410_v49, %v406_v47  ;;  %v367_v60 = vrot.slane %v365_v54, 1  ;;  %v456_v7 = vrot.slane %v1206_v42, 1  ;;  %v443_v8 = vrot.slane %v1461_v41, 1 }
  0x2e   : > { %518 = vrot.lane.b32.xlu1 %v1389_v48, %s1258_s5  ;;  %v363_v59 = vor.u32 %v362_v53, %v358_v51  ;;  %v444_v9 = vrot.slane %v1207_v44, 1 }
  0x2f   : > { %510 = vrot.lane.b32.xlu0 %v344_v40, %s1258_s5  ;;  %v442_v40 = vsel %vm433_vm0, %v440_v35, %v441_v36  ;;  %v416_v63 = vsel %vm320_vm1, %v411_v56, %v415_v58  ;;  %v457_v10 = vsel %vm433_vm0, %v455_v6, %v456_v7 }
  0x30   : > { %v368_v5 = vsel %vm320_vm1, %v363_v59, %v367_v60  ;;  %v445_v11 = vsel %vm433_vm0, %v443_v8, %v444_v9 }
  0x32   : > { %520 = vrot.lane.b32.xlu1 %v1425_v18, %s1258_s5 }
  0x33   : > { %512 = vrot.lane.b32.xlu0 %v1432_v26, %s1258_s5 }
  0x36   : > { %537 = vrot.lane.b32.xlu1 %v1365_v23, %s1259_s6 }
  0x37   : > { %529 = vrot.lane.b32.xlu0 %v1369_v27, %s1259_s6  ;;  %v1212_v27 = vld [vmem:[%s1738_s1] sm:$0xff]  }
  0x38   : > { %1113 = vmatprep.subr.bf16.mxu0 %v1212_v27  ;;  %1135 = vmatprep.subr.bf16.mxu1 %v1212_v27 }
  0x39   : > { %1114 = vmatpush3.bf16.msra.mxu0 %v1212_v27  ;;  %1138 = vmatpush3.bf16.msra.mxu1 %v1212_v27 }
  0x3a   : > { %539 = vrot.lane.b32.xlu1 %v1452_v37, %s1259_s6  ;;  %1115 = vmatprep.subr.bf16.mxu0 %v1213_v55 }
  0x3b   : > { %531 = vrot.lane.b32.xlu0 %v442_v40, %s1259_s6  ;;  %1136 = vmatprep.subr.bf16.mxu1 %v1213_v55 }
  0x3d   : > { %1116 = vmatpush3.bf16.msra.mxu0 %v1213_v55  ;;  %1139 = vmatpush3.bf16.msra.mxu1 %v1213_v55 }
  0x3e   : > { %558 = vrot.lane.b32.xlu1 %v1377_v39, %s1260_s7  ;;  %1141 = vmatprep.subr.msk.bf16.mxu0 %vm789_vm2, %v1214_v62 }
  0x3f   : > { %550 = vrot.lane.b32.xlu0 %v1384_v46, %s1260_s7  ;;  %1142 = vmatprep.subr.msk.bf16.mxu1 %vm789_vm2, %v1214_v62 }
  0x41   : > { %1118 = vmatpush3.bf16.msra.mxu0 %v791_v3  ;;  %1140 = vmatpush3.bf16.msra.mxu1 %v791_v3 }
  0x42   : > { %560 = vrot.lane.b32.xlu1 %v1455_v38, %s1260_s7 }
  0x43   : > { %552 = vrot.lane.b32.xlu0 %v1461_v41, %s1260_s7 }
  0x46   : > { %589 = vrot.lane.b32.xlu1 %v1425_v18, %s1261_s12 }
  0x47   : > { %581 = vrot.lane.b32.xlu0 %v1432_v26, %s1261_s12 }
  0x4a   : > { %591 = vrot.lane.b32.xlu1 %v416_v63, %s1261_s12 }
  0x4b   : > { %583 = vrot.lane.b32.xlu0 %v368_v5, %s1261_s12 }
  0x4e   : > { %608 = vrot.lane.b32.xlu1 %v1452_v37, %s1262_s22 }
  0x4f   : > { %600 = vrot.lane.b32.xlu0 %v442_v40, %s1262_s22 }
  0x52   : > { %429 = vrot.lane.b32.xlu1 %v1425_v18, %s1257_s30 }
  0x53   : > { %421 = vrot.lane.b32.xlu0 %v1432_v26, %s1257_s30 }
  0x56   : > { %610 = vrot.lane.b32.xlu1 %v457_v10, %s1262_s22 }
  0x57   : > { %602 = vrot.lane.b32.xlu0 %v445_v11, %s1262_s22 }
  0x5a   : > { %431 = vrot.lane.b32.xlu1 %v416_v63, %s1257_s30 }
  0x5b   : > { %423 = vrot.lane.b32.xlu0 %v368_v5, %s1257_s30  ;;  %s1062_s30 = sshll.u32 %s217_s25, 3 }
  0x5e   : > { %470 = vrot.lane.b32.xlu1 %v1452_v37, %s1256_s29 }
  0x5f   : > { %462 = vrot.lane.b32.xlu0 %v442_v40, %s1256_s29 }
  0x62   : > { %472 = vrot.lane.b32.xlu1 %v457_v10, %s1256_s29 }
  0x63   : > { %464 = vrot.lane.b32.xlu0 %v445_v11, %s1256_s29 }
  0x66   : > { %491 = vrot.lane.b32.xlu1 %v1455_v38, %s1255_s28 }
  0x67   : > { %483 = vrot.lane.b32.xlu0 %v1461_v41, %s1255_s28 }
  0x6a   : > { %493 = vrot.lane.b32.xlu1 %v1402_v57, %s1255_s28 }
  0x6b   : > { %485 = vrot.lane.b32.xlu0 %v1340_v2, %s1255_s28 }
  0x6e   : > { %522 = vrot.lane.b32.xlu1 %v416_v63, %s1258_s5 }
  0x6f   : > { %514 = vrot.lane.b32.xlu0 %v368_v5, %s1258_s5 }
  0x72   : > { %524 = vrot.lane.b32.xlu1 %v1435_v28, %s1258_s5 }
  0x73   : > { %516 = vrot.lane.b32.xlu0 %v1395_v52, %s1258_s5  ;;  %s1661_s5 = scalar_lea.vmem %s1741_s4, %s1062_s30 }
  0x76   : > { %541 = vrot.lane.b32.xlu1 %v457_v10, %s1259_s6 }
  0x77   : > { %533 = vrot.lane.b32.xlu0 %v445_v11, %s1259_s6 }
  0x7a   : > { %543 = vrot.lane.b32.xlu1 %v1429_v21, %s1259_s6 }
  0x7b   : > { %535 = vrot.lane.b32.xlu0 %v1353_v12, %s1259_s6 }
  0x7e   : > { %562 = vrot.lane.b32.xlu1 %v1402_v57, %s1260_s7 }
  0x7f   : > { %554 = vrot.lane.b32.xlu0 %v1340_v2, %s1260_s7 }
  0x82   : > { %564 = vrot.lane.b32.xlu1 %v1410_v61, %s1260_s7 }
  0x83   : > { %556 = vrot.lane.b32.xlu0 %v1330_v0, %s1260_s7 }
  0x86   : > { %593 = vrot.lane.b32.xlu1 %v1435_v28, %s1261_s12 }
  0x87   : > { %585 = vrot.lane.b32.xlu0 %v1395_v52, %s1261_s12 }
  0x88   : > { %v488_v13 = vpop.permute.xlu1 %487  ;;  %v480_v14 = vpop.permute.xlu0 %479 }
  0x8a   : > { %595 = vrot.lane.b32.xlu1 %v1446_v34, %s1261_s12 }
  0x8b   : > { %587 = vrot.lane.b32.xlu0 %v1389_v48, %s1261_s12 }
  0x8c   : > { %v467_v57 = vpop.permute.xlu1 %466 }
  0x8d   : > { %v459_v15 = vpop.permute.xlu0 %458 }
  0x8e   : > { %612 = vrot.lane.b32.xlu1 %v1429_v21, %s1262_s22 }
  0x8f   : > { %604 = vrot.lane.b32.xlu0 %v1353_v12, %s1262_s22 }
  0x90   : > { %v469_v61 = vpop.permute.xlu1 %468 }
  0x91   : > { %v461_v16 = vpop.permute.xlu0 %460 }
  0x92   : > { %614 = vrot.lane.b32.xlu1 %v1440_v31, %s1262_s22 }
  0x93   : > { %606 = vrot.lane.b32.xlu0 %v1365_v23, %s1262_s22 }
  0x94   : > { %v420_v52 = vpop.permute.xlu1 %419 }
  0x95   : > { %v418_v17 = vpop.permute.xlu0 %417  ;;  %v620_v56 = vsel %vm616_vm3, %v1333_v1, %v420_v52 }
  0x96   : > { %v618_v34 = vsel %vm616_vm3, %v1344_v4, %v418_v17  ;;  %v637_v3 = vsel %vm633_vm4, %v620_v56, %v461_v16 }
  0x97   : > { %v635_v40 = vsel %vm633_vm4, %v618_v34, %v459_v15 }
  0x98   : > { %v428_v18 = vpop.permute.xlu1 %427  ;;  %v652_v44 = vsel %vm650_vm6, %v635_v40, %v480_v14 }
  0x99   : > { %v426_v48 = vpop.permute.xlu0 %425  ;;  %v628_v49 = vsel %vm616_vm3, %v1330_v0, %v428_v18 }
  0x9a   : > { %v626_v23 = vsel %vm616_vm3, %v1340_v2, %v426_v48  ;;  %v645_v60 = vsel %vm633_vm4, %v628_v49, %v469_v61 }
  0x9b   : > { %v643_v36 = vsel %vm633_vm4, %v626_v23, %v467_v57 }
  0x9c   : > { %v490_v19 = vpop.permute.xlu1 %489  ;;  %v660_v42 = vsel %vm650_vm6, %v643_v36, %v488_v13 }
  0x9d   : > { %v482_v20 = vpop.permute.xlu0 %481  ;;  %v662_v62 = vsel %vm650_vm6, %v645_v60, %v490_v19 }
  0x9e   : > { %v654_v1 = vsel %vm650_vm6, %v637_v3, %v482_v20 }
  0xa0   : > { %v519_v22 = vpop.permute.xlu1 %518 }
  0xa1   : > { %v511_v24 = vpop.permute.xlu0 %510  ;;  %v677_v2 = vsel %vm667_vm5, %v660_v42, %v519_v22 }
  0xa2   : > { %v669_v27 = vsel %vm667_vm5, %v652_v44, %v511_v24 }
  0xa4   : > { %v521_v21 = vpop.permute.xlu1 %520 }
  0xa5   : > { %v513_v25 = vpop.permute.xlu0 %512  ;;  %v679_v5 = vsel %vm667_vm5, %v662_v62, %v521_v21 }
  0xa6   : > { %v671_v8 = vsel %vm667_vm5, %v654_v1, %v513_v25 }
  0xa8   : > { %v538_v26 = vpop.permute.xlu1 %537 }
  0xa9   : > { %v530_v12 = vpop.permute.xlu0 %529  ;;  %v694_v4 = vsel %vm684_vm7, %v677_v2, %v538_v26 }
  0xaa   : > { %v686_v50 = vsel %vm684_vm7, %v669_v27, %v530_v12 }
  0xac   : > { %v540_v28 = vpop.permute.xlu1 %539 }
  0xad   : > { %v532_v29 = vpop.permute.xlu0 %531  ;;  %v696_v6 = vsel %vm684_vm7, %v679_v5, %v540_v28 }
  0xae   : > { %v688_v10 = vsel %vm684_vm7, %v671_v8, %v532_v29 }
  0xb0   : > { %v559_v30 = vpop.permute.xlu1 %558 }
  0xb1   : > { %v551_v32 = vpop.permute.xlu0 %550  ;;  %v711_v47 = vsel %vm701_vm8, %v694_v4, %v559_v30 }
  0xb2   : > { %v703_v54 = vsel %vm701_vm8, %v686_v50, %v551_v32 }
  0xb4   : > { %v561_v31 = vpop.permute.xlu1 %560 }
  0xb5   : > { %v553_v33 = vpop.permute.xlu0 %552  ;;  %v713_v9 = vsel %vm701_vm8, %v696_v6, %v561_v31 }
  0xb6   : > { %v705_v14 = vsel %vm701_vm8, %v688_v10, %v553_v33 }
  0xb8   : > { %v590_v35 = vpop.permute.xlu1 %589 }
  0xb9   : > { %v582_v37 = vpop.permute.xlu0 %581  ;;  %v728_v51 = vsel %vm718_vm9, %v711_v47, %v590_v35 }
  0xba   : > { %v720_v58 = vsel %vm718_vm9, %v703_v54, %v582_v37 }
  0xbc   : > { %v592_v43 = vpop.permute.xlu1 %591 }
  0xbd   : > { %v584_v45 = vpop.permute.xlu0 %583  ;;  %v730_v11 = vsel %vm718_vm9, %v713_v9, %v592_v43 }
  0xbe   : > { %v722_v15 = vsel %vm718_vm9, %v705_v14, %v584_v45 }
  0xc0   : > { %v609_v53 = vpop.permute.xlu1 %608 }
  0xc1   : > { %v745_v55 = vsel %vm735_vm10, %v728_v51, %v609_v53  ;;  %v601_v59 = vpop.permute.xlu0 %600 }
  0xc2   : > { %1127 = vmatprep.mubr.msk.bf16.mxu1 %vm772_vm11, %v745_v55  ;;  %v737_v0 = vsel %vm735_vm10, %v720_v58, %v601_v59 }
  0xc3   : > { %1119 = vmatprep.mubr.msk.bf16.mxu0 %vm772_vm11, %v737_v0 }
  0xc4   : > { %v430_v63 = vpop.permute.xlu1 %429 }
  0xc5   : > { %v422_v7 = vpop.permute.xlu0 %421  ;;  %v630_v40 = vsel %vm616_vm3, %v1377_v39, %v430_v63 }
  0xc6   : > { %v622_v2 = vsel %vm616_vm3, %v1384_v46, %v422_v7 }
  0xc8   : > { %v611_v13 = vpop.permute.xlu1 %610 }
  0xc9   : > { %v747_v57 = vsel %vm735_vm10, %v730_v11, %v611_v13  ;;  %v603_v61 = vpop.permute.xlu0 %602 }
  0xca   : > { %1128 = vmatmul.mubr.msk.bf16.vlgmr.msra.gmra.mrb[0].mxu1 %vm772_vm11, %v747_v57  ;;  %v739_v16 = vsel %vm735_vm10, %v722_v15, %v603_v61  ;;  %v1646_v61 = vld [vmem:[%s1739_s2] ss:$0 sm:$0xff] }
  0xcb   : > { %1120 = vmatmul.mubr.msk.bf16.vlgmr.msra.gmra.mrb[0].mxu0 %vm772_vm11, %v739_v16  ;;  %v1651_v16 = vld [vmem:[%s1740_s3] ss:$0 sm:$0xff] }
  0xcc   : > { %v432_v52 = vpop.permute.xlu1 %431 }
  0xcd   : > { %v424_v17 = vpop.permute.xlu0 %423  ;;  %v632_v47 = vsel %vm616_vm3, %v1455_v38, %v432_v52 }
  0xce   : > { %v624_v54 = vsel %vm616_vm3, %v1461_v41, %v424_v17 }
  0xd0   : > { %v471_v18 = vpop.permute.xlu1 %470 }
  0xd1   : > { %v463_v48 = vpop.permute.xlu0 %462  ;;  %v647_v43 = vsel %vm633_vm4, %v630_v40, %v471_v18 }
  0xd2   : > { %v639_v45 = vsel %vm633_vm4, %v622_v2, %v463_v48 }
  0xd4   : > { %v473_v19 = vpop.permute.xlu1 %472 }
  0xd5   : > { %v465_v20 = vpop.permute.xlu0 %464  ;;  %v649_v51 = vsel %vm633_vm4, %v632_v47, %v473_v19 }
  0xd6   : > { %v641_v59 = vsel %vm633_vm4, %v624_v54, %v465_v20 }
  0xd8   : > { %v492_v22 = vpop.permute.xlu1 %491 }
  0xd9   : > { %v484_v24 = vpop.permute.xlu0 %483  ;;  %v664_v44 = vsel %vm650_vm6, %v647_v43, %v492_v22 }
  0xda   : > { %v656_v49 = vsel %vm650_vm6, %v639_v45, %v484_v24 }
  0xdc   : > { %v494_v21 = vpop.permute.xlu1 %493 }
  0xdd   : > { %v486_v25 = vpop.permute.xlu0 %485  ;;  %v666_v55 = vsel %vm650_vm6, %v649_v51, %v494_v21 }
  0xde   : > { %v658_v63 = vsel %vm650_vm6, %v641_v59, %v486_v25 }
  0xe0   : > { %v523_v26 = vpop.permute.xlu1 %522 }
  0xe1   : > { %v515_v12 = vpop.permute.xlu0 %514  ;;  %v681_v27 = vsel %vm667_vm5, %v664_v44, %v523_v26 }
  0xe2   : > { %v673_v53 = vsel %vm667_vm5, %v656_v49, %v515_v12 }
  0xe4   : > { %v525_v28 = vpop.permute.xlu1 %524 }
  0xe5   : > { %v517_v29 = vpop.permute.xlu0 %516  ;;  %v683_v60 = vsel %vm667_vm5, %v666_v55, %v525_v28 }
  0xe6   : > { %v675_v1 = vsel %vm667_vm5, %v658_v63, %v517_v29 }
  0xe8   : > { %v542_v30 = vpop.permute.xlu1 %541 }
  0xe9   : > { %v534_v32 = vpop.permute.xlu0 %533  ;;  %v698_v39 = vsel %vm684_vm7, %v681_v27, %v542_v30 }
  0xea   : > { %v690_v56 = vsel %vm684_vm7, %v673_v53, %v534_v32 }
  0xec   : > { %v544_v31 = vpop.permute.xlu1 %543 }
  0xed   : > { %v536_v23 = vpop.permute.xlu0 %535  ;;  %v700_v3 = vsel %vm684_vm7, %v683_v60, %v544_v31 }
  0xee   : > { %v692_v8 = vsel %vm684_vm7, %v675_v1, %v536_v23 }
  0xf0   : > { %v563_v33 = vpop.permute.xlu1 %562 }
  0xf1   : > { %v555_v34 = vpop.permute.xlu0 %554  ;;  %v715_v46 = vsel %vm701_vm8, %v698_v39, %v563_v33 }
  0xf2   : > { %v707_v0 = vsel %vm701_vm8, %v690_v56, %v555_v34 }
  0xf4   : > { %v565_v35 = vpop.permute.xlu1 %564 }
  0xf5   : > { %v557_v36 = vpop.permute.xlu0 %556  ;;  %v717_v6 = vsel %vm701_vm8, %v700_v3, %v565_v35 }
  0xf6   : > { %v709_v11 = vsel %vm701_vm8, %v692_v8, %v557_v36 }
  0xf8   : > { %v594_v37 = vpop.permute.xlu1 %593 }
  0xf9   : > { %v586_v42 = vpop.permute.xlu0 %585  ;;  %v732_v38 = vsel %vm718_vm9, %v715_v46, %v594_v37 }
  0xfa   : > { %v724_v41 = vsel %vm718_vm9, %v707_v0, %v586_v42 }
  0xfc   : > { %v596_v4 = vpop.permute.xlu1 %595 }
  0xfd   : > { %v588_v50 = vpop.permute.xlu0 %587  ;;  %v734_v9 = vsel %vm718_vm9, %v717_v6, %v596_v4 }
  0xfe   : > { %v726_v14 = vsel %vm718_vm9, %v709_v11, %v588_v50 }
 0x100   : > { %v613_v58 = vpop.permute.xlu1 %612 }
 0x101   : > { %v749_v62 = vsel %vm735_vm10, %v732_v38, %v613_v58  ;;  %v605_v5 = vpop.permute.xlu0 %604 }
 0x102   : > { %1131 = vmatprep.mubr.msk.bf16.mxu1 %vm772_vm11, %v749_v62  ;;  %v741_v7 = vsel %vm735_vm10, %v724_v41, %v605_v5 }
 0x103   : > { %1123 = vmatprep.mubr.msk.bf16.mxu0 %vm772_vm11, %v741_v7 }
 0x104   : > { %v615_v10 = vpop.permute.xlu1 %614 }
 0x105   : > { %v751_v13 = vsel %vm735_vm10, %v734_v9, %v615_v10  ;;  %v607_v57 = vpop.permute.xlu0 %606 }
 0x106   : > { %1132 = vmatmul.mubr.msk.bf16.gmra.mrb[4].mxu1 %vm772_vm11, %v751_v13  ;;  %v743_v15 = vsel %vm735_vm10, %v726_v14, %v607_v57 }
 0x107   : > { %1124 = vmatmul.mubr.msk.bf16.gmra.mrb[4].mxu0 %vm772_vm11, %v743_v15 }
 0x19d   : > { %v1129_v52 = vpop.f32.mrb[0].mxu1 }
 0x19e   : > { %v907_v17 = vmul.f32 %v1129_v52, %v1646_v61  ;;  %v859_v18 = vpop.f32.mrb[1].mxu1  ;;  %v1121_v48 = vpop.f32.mrb[0].mxu0 }
 0x19f   : > { %v905_v19 = vmul.f32 %v1646_v61, %v859_v18  ;;  %v1130_v20 = vpop.f32.mrb[2].mxu1  ;;  %v899_v22 = vmul.f32 %v1121_v48, %v1646_v61  ;;  %v827_v21 = vpop.f32.mrb[1].mxu0 }
 0x1a0   : > { %v930_v24 = vadd.f32 %v1651_v16, %v907_v17  ;;  %v908_v25 = vmul.f32 %v1130_v20, %v1646_v61  ;;  %v862_v26 = vpop.f32.mrb[3].mxu1  ;;  %v897_v12 = vmul.f32 %v1646_v61, %v827_v21  ;;  %v1122_v29 = vpop.f32.mrb[2].mxu0 }
 0x1a1   : > { %v928_v28 = vadd.f32 %v1651_v16, %v905_v19  ;;  %v906_v30 = vmul.f32 %v1646_v61, %v862_v26  ;;  %v922_v32 = vadd.f32 %v1651_v16, %v899_v22  ;;  %v900_v23 = vmul.f32 %v1122_v29, %v1646_v61  ;;  %v830_v34 = vpop.f32.mrb[3].mxu0 }
 0x1a2   : > { %v946_v31 = vmax.f32 %v930_v24, 0.0  ;;  %v931_v33 = vadd.f32 %v1651_v16, %v908_v25  ;;  %v920_v35 = vadd.f32 %v1651_v16, %v897_v12  ;;  %v898_v37 = vmul.f32 %v1646_v61, %v830_v34 }
 0x1a3   : > { %v944_v36 = vmax.f32 %v928_v28, 0.0  ;;  %v929_v40 = vadd.f32 %v1651_v16, %v906_v30  ;;  %v938_v42 = vmax.f32 %v922_v32, 0.0  ;;  %v923_v43 = vadd.f32 %v1651_v16, %v900_v23 }
 0x1a4   : > { %962 = vst.msk [vmem:[%s1661_s5 + $0x50] sm:$0xff] %vm633_vm4, %v946_v31  ;;  %v947_v2 = vmax.f32 %v931_v33, 0.0  ;;  %v936_v44 = vmax.f32 %v920_v35, 0.0  ;;  %v921_v4 = vadd.f32 %v1651_v16, %v898_v37 }
 0x1a5   : > { %960 = vst.msk [vmem:[%s1661_s5 + $0x40] sm:$0xff] %vm633_vm4, %v944_v36  ;;  %v945_v45 = vmax.f32 %v929_v40, 0.0  ;;  %954 = vst.msk [vmem:[%s1661_s5 + $0x10] sm:$0xff] %vm633_vm4, %v938_v42  ;;  %v939_v27 = vmax.f32 %v923_v43, 0.0 }
 0x1a6   : > { %963 = vst.msk [vmem:[%s1661_s5 + $0x58] sm:$0xff] %vm633_vm4, %v947_v2  ;;  %952 = vst.msk [vmem:[%s1661_s5] sm:$0xff] %vm633_vm4, %v936_v44  ;;  %v937_v47 = vmax.f32 %v921_v4, 0.0 }
 0x1a7   : > { %961 = vst.msk [vmem:[%s1661_s5 + $0x48] sm:$0xff] %vm633_vm4, %v945_v45  ;;  %955 = vst.msk [vmem:[%s1661_s5 + $0x18] sm:$0xff] %vm633_vm4, %v939_v27 }
 0x1a8   : > { %953 = vst.msk [vmem:[%s1661_s5 + $0x8] sm:$0xff] %vm633_vm4, %v937_v47 }
 0x1d9   : > { %v1133_v49 = vpop.f32.mrb[4].mxu1 }
 0x1da   : > { %v911_v39 = vmul.f32 %v1133_v49, %v1646_v61  ;;  %v875_v50 = vpop.f32.mrb[5].mxu1  ;;  %v1125_v51 = vpop.f32.mrb[4].mxu0 }
 0x1db   : > { %v909_v53 = vmul.f32 %v1646_v61, %v875_v50  ;;  %v1134_v46 = vpop.f32.mrb[6].mxu1  ;;  %v903_v54 = vmul.f32 %v1125_v51, %v1646_v61  ;;  %v843_v56 = vpop.f32.mrb[5].mxu0 }
 0x1dc   : > { %v934_v55 = vadd.f32 %v1651_v16, %v911_v39  ;;  %v912_v38 = vmul.f32 %v1134_v46, %v1646_v61  ;;  %v878_v58 = vpop.f32.mrb[7].mxu1  ;;  %v901_v59 = vmul.f32 %v1646_v61, %v843_v56  ;;  %v1126_v0 = vpop.f32.mrb[6].mxu0 }
 0x1dd   : > { %v932_v60 = vadd.f32 %v1651_v16, %v909_v53  ;;  %v910_v62 = vmul.f32 %v1646_v61, %v878_v58  ;;  %v926_v63 = vadd.f32 %v1651_v16, %v903_v54  ;;  %v904_v41 = vmul.f32 %v1126_v0, %v1646_v61  ;;  %v846_v1 = vpop.f32.mrb[7].mxu0 }
 0x1de   : > { %v950_v3 = vmax.f32 %v934_v55, 0.0  ;;  %v935_v5 = vadd.f32 %v1651_v16, %v912_v38  ;;  %v924_v6 = vadd.f32 %v1651_v16, %v901_v59  ;;  %v902_v8 = vmul.f32 %v1646_v61, %v846_v1 }
 0x1df   : > { %v948_v7 = vmax.f32 %v932_v60, 0.0  ;;  %v933_v9 = vadd.f32 %v1651_v16, %v910_v62  ;;  %v942_v10 = vmax.f32 %v926_v63, 0.0  ;;  %v927_v11 = vadd.f32 %v1651_v16, %v904_v41 }
 0x1e0   : > { %966 = vst.msk [vmem:[%s1661_s5 + $0x70] sm:$0xff] %vm633_vm4, %v950_v3  ;;  %v951_v13 = vmax.f32 %v935_v5, 0.0  ;;  %v940_v14 = vmax.f32 %v924_v6, 0.0  ;;  %v925_v57 = vadd.f32 %v1651_v16, %v902_v8 }
 0x1e1   : > { %964 = vst.msk [vmem:[%s1661_s5 + $0x60] sm:$0xff] %vm633_vm4, %v948_v7  ;;  %v949_v15 = vmax.f32 %v933_v9, 0.0  ;;  %958 = vst.msk [vmem:[%s1661_s5 + $0x30] sm:$0xff] %vm633_vm4, %v942_v10  ;;  %v943_v52 = vmax.f32 %v927_v11, 0.0 }
 0x1e2   : > { %967 = vst.msk [vmem:[%s1661_s5 + $0x78] sm:$0xff] %vm633_vm4, %v951_v13  ;;  %956 = vst.msk [vmem:[%s1661_s5 + $0x20] sm:$0xff] %vm633_vm4, %v940_v14  ;;  %v941_v61 = vmax.f32 %v925_v57, 0.0 }
 0x1e3   : > { %965 = vst.msk [vmem:[%s1661_s5 + $0x68] sm:$0xff] %vm633_vm4, %v949_v15  ;;  %959 = vst.msk [vmem:[%s1661_s5 + $0x38] sm:$0xff] %vm633_vm4, %v943_v52 }
 0x1e4   : > { %957 = vst.msk [vmem:[%s1661_s5 + $0x28] sm:$0xff] %vm633_vm4, %v941_v61 }
 0x1e5 PF: > { %s14_s19 = sadd.s32 1, %s1253_s19   ;;  %s1742_s15 = smov %s1245_s17 }
 0x1e6   : > { %p11_p7 = scmp.ge.s32.totalorder %s14_s19, 6   ;;  %s1743_s16 = smov %s1249_s18 }
 0x1e7   : > { %s1744_s17 = smov %s1747_s20  ;;  %s1745_s18 = smov %s1751_s21 }
 0x1e8   :  { %13 = sbr.rel (!%p11_p7) target bundleno = 3 (0x3), region = 67 }

</bundles_post_ra>
